<compile_context>
chip_gen: v5e
topology: v5e:2x2
jax: 0.10.0
libtpu: 0.0.40
codegen_flags: <defaults>
</compile_context>

<pallas_src>
import functools

import jax
import jax.numpy as jnp
from jax.experimental import pallas as pl
from jax.experimental.pallas import tpu as pltpu


# ----------------------------------------------------------------------------
# Fused kernel
# ----------------------------------------------------------------------------
def mlp_fused_kernel(x_ref, w1_ref, bn1_ref, w2_ref, bn2_ref, w3_ref, b3_ref,
                     o_ref, *, eps):
    """Whole MLP forward; activations never leave VMEM.

    x_ref   : (B, D_in)          bf16 input (MXU input dtype)
    w1_ref  : (D_in, 256)        bf16 Linear1 weight (transposed torch layout)
    bn1_ref : (2, 256)           f32  BN1 [gamma; beta]
    w2_ref  : (256, 64)          bf16 Linear2 weight
    bn2_ref : (2, 64)            f32  BN2 [gamma; beta]
    w3_ref  : (64, num_classes)  bf16 Linear3 weight
    b3_ref  : (1, num_classes)   f32  Linear3 bias (no BN after -> bias kept)
    o_ref   : (B, num_classes)   f32
    """
    def batchnorm_relu(y, bn_ref):
        # Train-mode BatchNorm1d (biased batch variance), two-pass statistics.
        inv_n = 1.0 / y.shape[0]
        mean = jnp.sum(y, axis=0, keepdims=True) * inv_n
        d = y - mean
        var = jnp.sum(d * d, axis=0, keepdims=True) * inv_n
        gamma = bn_ref[0:1, :]
        beta = bn_ref[1:2, :]
        y = d * jax.lax.rsqrt(var + eps) * gamma + beta
        return jnp.maximum(y, 0.0)

    # Linear(D_in,256) [bias cancels under train-mode BN] + BN + Dropout + ReLU
    # TODO(synk): Dropout is identity here (train-mode dropout is stochastic).
    h = jnp.dot(x_ref[...], w1_ref[...], preferred_element_type=jnp.float32)
    h = batchnorm_relu(h, bn1_ref)

    # Linear(256,64) [bias cancels under BN] + BN + ReLU
    h = jnp.dot(h.astype(jnp.bfloat16), w2_ref[...],
                preferred_element_type=jnp.float32)
    h = batchnorm_relu(h, bn2_ref)

    # Linear(64,num_classes) + bias.  (B,num_classes) is lane-sparse but it is
    # the only HBM store of the whole network -- leave it as-is.
    o_ref[...] = (jnp.dot(h.astype(jnp.bfloat16), w3_ref[...],
                          preferred_element_type=jnp.float32) + b3_ref[...])


# ----------------------------------------------------------------------------
# Wrapper
# ----------------------------------------------------------------------------
_VMEM = pl.BlockSpec(memory_space=pltpu.MemorySpace.VMEM)


def mlp_forward_pallas(x, params, *, eps=1e-5):
    B, d_in = x.shape
    d1 = params["w1"].shape[-1]
    d2 = params["w2"].shape[-1]
    num_classes = params["w3"].shape[-1]

    flops = 2 * B * (d_in * d1 + d1 * d2 + d2 * num_classes)
    bytes_accessed = (
        B * d_in * 2                                 # x (bf16)
        + (d_in * d1 + d1 * d2 + d2 * num_classes) * 2  # weights (bf16)
        + (2 * d1 + 2 * d2 + num_classes) * 4        # BN slabs + b3 (f32)
        + B * num_classes * 4                        # output (f32)
    )

    kern = functools.partial(mlp_fused_kernel, eps=eps)
    return pl.pallas_call(
        kern,
        out_shape=jax.ShapeDtypeStruct((B, num_classes), jnp.float32),
        in_specs=[_VMEM] * 7,
        out_specs=_VMEM,
        cost_estimate=pl.CostEstimate(
            flops=flops, transcendentals=0, bytes_accessed=bytes_accessed),
        compiler_params=pltpu.CompilerParams(vmem_limit_bytes=32 * 1024 * 1024),
    )(x.astype(jnp.bfloat16),
      params["w1"], params["bn1"],
      params["w2"], params["bn2"],
      params["w3"], params["b3"].reshape(1, -1))


# ----------------------------------------------------------------------------
# Parameter init (torch-like Linear init; slightly randomized BN).
# Weights are converted to bf16 ONCE here (not per call) per the perf review.
# BN params are packed into (2, N) [gamma; beta] slabs to cut DMA descriptors.
# ----------------------------------------------------------------------------
def init_params(key, input_size=1456, num_classes=2):
    def linear_init(k, fan_in, fan_out):
        kw, kb = jax.random.split(k)
        bound = 1.0 / float(fan_in) ** 0.5
        w = jax.random.uniform(kw, (fan_in, fan_out), jnp.float32, -bound, bound)
        b = jax.random.uniform(kb, (fan_out,), jnp.float32, -bound, bound)
        return w, b

    k1, k2, k3, kg1, kb1, kg2, kb2 = jax.random.split(key, 7)
    w1, b1 = linear_init(k1, input_size, 256)
    w2, b2 = linear_init(k2, 256, 64)
    w3, b3 = linear_init(k3, 64, num_classes)

    g1 = 1.0 + 0.1 * jax.random.normal(kg1, (256,), jnp.float32)
    be1 = 0.1 * jax.random.normal(kb1, (256,), jnp.float32)
    g2 = 1.0 + 0.1 * jax.random.normal(kg2, (64,), jnp.float32)
    be2 = 0.1 * jax.random.normal(kb2, (64,), jnp.float32)

    return dict(
        # bf16 weights: cast once at init, halves the dominant HBM DMA.
        w1=w1.astype(jnp.bfloat16),
        w2=w2.astype(jnp.bfloat16),
        w3=w3.astype(jnp.bfloat16),
        # Packed BN slabs: row 0 = gamma, row 1 = beta.
        bn1=jnp.stack([g1, be1], axis=0),
        bn2=jnp.stack([g2, be2], axis=0),
        b3=b3,
        # b1/b2 kept only for the reference (they cancel under train-mode BN).
        b1=b1, b2=b2,
    )


# ----------------------------------------------------------------------------
# Pure-JAX reference (full PyTorch train-mode structure: biases present,
# two-pass BN stats, dropout as identity).  Matmul inputs use the same bf16
# dtype as the kernel's MXU path so the tolerance stays tight.
# ----------------------------------------------------------------------------
def mlp_forward_ref(x, params, eps=1e-5):
    def lin(h, w, b):
        y = jnp.dot(h.astype(jnp.bfloat16), w.astype(jnp.bfloat16),
                    preferred_element_type=jnp.float32)
        return y + b

    def bn(y, gb):
        g, be = gb[0], gb[1]
        mean = jnp.mean(y, axis=0, keepdims=True)
        var = jnp.mean((y - mean) ** 2, axis=0, keepdims=True)
        return (y - mean) / jnp.sqrt(var + eps) * g + be

    h = lin(x, params["w1"], params["b1"])
    h = jnp.maximum(bn(h, params["bn1"]), 0.0)    # Dropout ≡ identity
    h = lin(h, params["w2"], params["b2"])
    h = jnp.maximum(bn(h, params["bn2"]), 0.0)
    return lin(h, params["w3"], params["b3"])


# ----------------------------------------------------------------------------
if __name__ == "__main__":
    key = jax.random.PRNGKey(0)
    key, kx = jax.random.split(key)

    B, INPUT_SIZE, NUM_CLASSES = 8, 1456, 2   # module defaults; B=8 fills sublanes
    x = jax.random.normal(kx, (B, INPUT_SIZE), jnp.float32)
    params = init_params(key, input_size=INPUT_SIZE, num_classes=NUM_CLASSES)

    logits = mlp_forward_pallas(x, params)
    logits = jax.block_until_ready(logits)

    ref = mlp_forward_ref(x, params)
    assert logits.shape == (B, NUM_CLASSES)
    # Kernel drops b1/b2 (they cancel under train-mode BN up to f32 rounding
    # after the bf16 matmul), so kernel and reference agree to ~last-ulp level.
    assert jnp.allclose(logits, ref, rtol=2e-3, atol=2e-3), (logits, ref)

    print("KERNEL_OK")
</pallas_src>

<mosaic_0001>
module attributes {stable_mosaic.version = 11 : i64} {
  func.func @mlp_fused_kernel(%arg0: memref<8x1456xbf16, #tpu.memory_space<vmem>>, %arg1: memref<1456x256xbf16, #tpu.memory_space<vmem>>, %arg2: memref<2x256xf32, #tpu.memory_space<vmem>>, %arg3: memref<256x64xbf16, #tpu.memory_space<vmem>>, %arg4: memref<2x64xf32, #tpu.memory_space<vmem>>, %arg5: memref<64x2xbf16, #tpu.memory_space<vmem>>, %arg6: memref<1x2xf32, #tpu.memory_space<vmem>>, %arg7: memref<8x2xf32, #tpu.memory_space<vmem>>) attributes {dimension_semantics = [], scalar_prefetch = 0 : i64, scratch_operands = 0 : i64, tpu.core_type = #tpu.core_type<tc>} {
    %c0 = arith.constant 0 : index
    %c0_0 = arith.constant 0 : index
    %0 = vector.load %arg0[%c0, %c0_0] : memref<8x1456xbf16, #tpu.memory_space<vmem>>, vector<8x1456xbf16>
    %c0_1 = arith.constant 0 : index
    %c0_2 = arith.constant 0 : index
    %1 = vector.load %arg1[%c0_1, %c0_2] : memref<1456x256xbf16, #tpu.memory_space<vmem>>, vector<1456x256xbf16>
    %cst = arith.constant dense<0.000000e+00> : vector<8x256xf32>
    %2 = tpu.matmul %0, %1, %cst {dimension_numbers = #tpu.dot_dimension_numbers<[1], [0], [0], [1], [0, 0, 1, 1], [], []>} : vector<8x1456xbf16>, vector<1456x256xbf16>, vector<8x256xf32> -> vector<8x256xf32>
    %cst_3 = arith.constant dense<0.000000e+00> : vector<256xf32>
    %3 = vector.multi_reduction <add>, %2, %cst_3 [0] : vector<8x256xf32> to vector<256xf32>
    %4 = vector.shape_cast %3 : vector<256xf32> to vector<1x256xf32>
    %cst_4 = arith.constant 1.250000e-01 : f32
    %5 = vector.broadcast %cst_4 : f32 to vector<1x256xf32>
    %6 = arith.mulf %4, %5 : vector<1x256xf32>
    %7 = vector.broadcast %6 : vector<1x256xf32> to vector<8x256xf32>
    %8 = arith.subf %2, %7 : vector<8x256xf32>
    %9 = arith.mulf %8, %8 : vector<8x256xf32>
    %cst_5 = arith.constant dense<0.000000e+00> : vector<256xf32>
    %10 = vector.multi_reduction <add>, %9, %cst_5 [0] : vector<8x256xf32> to vector<256xf32>
    %11 = vector.shape_cast %10 : vector<256xf32> to vector<1x256xf32>
    %cst_6 = arith.constant 1.250000e-01 : f32
    %12 = vector.broadcast %cst_6 : f32 to vector<1x256xf32>
    %13 = arith.mulf %11, %12 : vector<1x256xf32>
    %c0_7 = arith.constant 0 : index
    %c0_8 = arith.constant 0 : index
    %14 = vector.load %arg2[%c0_7, %c0_8] : memref<2x256xf32, #tpu.memory_space<vmem>>, vector<1x256xf32>
    %c1 = arith.constant 1 : index
    %c0_9 = arith.constant 0 : index
    %15 = vector.load %arg2[%c1, %c0_9] : memref<2x256xf32, #tpu.memory_space<vmem>>, vector<1x256xf32>
    %cst_10 = arith.constant 9.99999974E-6 : f32
    %16 = vector.broadcast %cst_10 : f32 to vector<1x256xf32>
    %17 = arith.addf %13, %16 : vector<1x256xf32>
    %18 = math.rsqrt %17 : vector<1x256xf32>
    %19 = vector.broadcast %18 : vector<1x256xf32> to vector<8x256xf32>
    %20 = arith.mulf %8, %19 : vector<8x256xf32>
    %21 = vector.broadcast %14 : vector<1x256xf32> to vector<8x256xf32>
    %22 = arith.mulf %20, %21 : vector<8x256xf32>
    %23 = vector.broadcast %15 : vector<1x256xf32> to vector<8x256xf32>
    %24 = arith.addf %22, %23 : vector<8x256xf32>
    %cst_11 = arith.constant 0.000000e+00 : f32
    %25 = vector.broadcast %cst_11 : f32 to vector<8x256xf32>
    %26 = arith.maximumf %24, %25 : vector<8x256xf32>
    %27 = arith.truncf %26 : vector<8x256xf32> to vector<8x256xbf16>
    %c0_12 = arith.constant 0 : index
    %c0_13 = arith.constant 0 : index
    %28 = vector.load %arg3[%c0_12, %c0_13] : memref<256x64xbf16, #tpu.memory_space<vmem>>, vector<256x64xbf16>
    %cst_14 = arith.constant dense<0.000000e+00> : vector<8x64xf32>
    %29 = tpu.matmul %27, %28, %cst_14 {dimension_numbers = #tpu.dot_dimension_numbers<[1], [0], [0], [1], [0, 0, 1, 1], [], []>} : vector<8x256xbf16>, vector<256x64xbf16>, vector<8x64xf32> -> vector<8x64xf32>
    %cst_15 = arith.constant dense<0.000000e+00> : vector<64xf32>
    %30 = vector.multi_reduction <add>, %29, %cst_15 [0] : vector<8x64xf32> to vector<64xf32>
    %31 = vector.shape_cast %30 : vector<64xf32> to vector<1x64xf32>
    %cst_16 = arith.constant 1.250000e-01 : f32
    %32 = vector.broadcast %cst_16 : f32 to vector<1x64xf32>
    %33 = arith.mulf %31, %32 : vector<1x64xf32>
    %34 = vector.broadcast %33 : vector<1x64xf32> to vector<8x64xf32>
    %35 = arith.subf %29, %34 : vector<8x64xf32>
    %36 = arith.mulf %35, %35 : vector<8x64xf32>
    %cst_17 = arith.constant dense<0.000000e+00> : vector<64xf32>
    %37 = vector.multi_reduction <add>, %36, %cst_17 [0] : vector<8x64xf32> to vector<64xf32>
    %38 = vector.shape_cast %37 : vector<64xf32> to vector<1x64xf32>
    %cst_18 = arith.constant 1.250000e-01 : f32
    %39 = vector.broadcast %cst_18 : f32 to vector<1x64xf32>
    %40 = arith.mulf %38, %39 : vector<1x64xf32>
    %c0_19 = arith.constant 0 : index
    %c0_20 = arith.constant 0 : index
    %41 = vector.load %arg4[%c0_19, %c0_20] : memref<2x64xf32, #tpu.memory_space<vmem>>, vector<1x64xf32>
    %c1_21 = arith.constant 1 : index
    %c0_22 = arith.constant 0 : index
    %42 = vector.load %arg4[%c1_21, %c0_22] : memref<2x64xf32, #tpu.memory_space<vmem>>, vector<1x64xf32>
    %cst_23 = arith.constant 9.99999974E-6 : f32
    %43 = vector.broadcast %cst_23 : f32 to vector<1x64xf32>
    %44 = arith.addf %40, %43 : vector<1x64xf32>
    %45 = math.rsqrt %44 : vector<1x64xf32>
    %46 = vector.broadcast %45 : vector<1x64xf32> to vector<8x64xf32>
    %47 = arith.mulf %35, %46 : vector<8x64xf32>
    %48 = vector.broadcast %41 : vector<1x64xf32> to vector<8x64xf32>
    %49 = arith.mulf %47, %48 : vector<8x64xf32>
    %50 = vector.broadcast %42 : vector<1x64xf32> to vector<8x64xf32>
    %51 = arith.addf %49, %50 : vector<8x64xf32>
    %cst_24 = arith.constant 0.000000e+00 : f32
    %52 = vector.broadcast %cst_24 : f32 to vector<8x64xf32>
    %53 = arith.maximumf %51, %52 : vector<8x64xf32>
    %54 = arith.truncf %53 : vector<8x64xf32> to vector<8x64xbf16>
    %c0_25 = arith.constant 0 : index
    %c0_26 = arith.constant 0 : index
    %55 = vector.load %arg5[%c0_25, %c0_26] : memref<64x2xbf16, #tpu.memory_space<vmem>>, vector<64x2xbf16>
    %cst_27 = arith.constant dense<0.000000e+00> : vector<8x2xf32>
    %56 = tpu.matmul %54, %55, %cst_27 {dimension_numbers = #tpu.dot_dimension_numbers<[1], [0], [0], [1], [0, 0, 1, 1], [], []>} : vector<8x64xbf16>, vector<64x2xbf16>, vector<8x2xf32> -> vector<8x2xf32>
    %c0_28 = arith.constant 0 : index
    %c0_29 = arith.constant 0 : index
    %57 = vector.load %arg6[%c0_28, %c0_29] : memref<1x2xf32, #tpu.memory_space<vmem>>, vector<1x2xf32>
    %58 = vector.broadcast %57 : vector<1x2xf32> to vector<8x2xf32>
    %59 = arith.addf %56, %58 : vector<8x2xf32>
    %c0_30 = arith.constant 0 : index
    %c0_31 = arith.constant 0 : index
    %60 = vector.load %arg7[%c0_30, %c0_31] : memref<8x2xf32, #tpu.memory_space<vmem>>, vector<8x2xf32>
    tpu.vector_store %arg7[%c0_30, %c0_31], %59 {strides = array<i32>} : memref<8x2xf32, #tpu.memory_space<vmem>>, vector<8x2xf32>,
    return
  }
}

</mosaic_0001>

<bundles_post_ra>
// kernel: tpu_custom_call.1
= control target key start
LH: loop header
LB: loop body
LE: loop exit
PB: predicated region body
PF: predicated region fallthrough
CT: control target
= control target key end

     0   :  { %12 = vsyncpa [#allocation3], 0  ;;  %s2879_s27 = smov [#allocation2]   ;;  %s2880_s29 = smov 128   ;;  %s3086_s0 = inlined_call_operand.vmem [shape: bf16[8,1456], index: 0, kind: input, shape index: {}]   ;;  %s3087_s1 = inlined_call_operand.hbm [shape: bf16[1456,256], index: 1, kind: input, shape index: {}]   ;;  %s3088_s2 = inlined_call_operand.vmem [shape: f32[2,256], index: 2, kind: input, shape index: {}]   ;;  %s3089_s3 = inlined_call_operand.vmem [shape: bf16[256,64], index: 3, kind: input, shape index: {}]   ;;  %s3090_s4 = inlined_call_operand.vmem [shape: f32[2,64], index: 4, kind: input, shape index: {}]   ;;  %s3091_s5 = inlined_call_operand.vmem [shape: bf16[64,2], index: 5, kind: input, shape index: {}]   ;;  %s3092_s6 = inlined_call_operand.vmem [shape: f32[1,2], index: 6, kind: input, shape index: {}]   ;;  %s3093_s7 = inlined_call_operand.vmem [shape: f32[8,2], index: 7, kind: output, shape index: {}]  }
   0x1   :  { %s19_s26 = sshll.u32 %s3087_s1, 4  ;;  %s21_s28 = sshll.u32 %s2879_s27, 4  ;;  %s20_s26 = int_to_ptr.hbm [resolvable:$true] %s19_s26  ;;  %s22_s28 = int_to_ptr.vmem [resolvable:$true] %s21_s28 }
   0x2   :  { %s2881_s30 = smov 8  }
   0x3   :  { %27 = dma.hbm_to_vmem [thread:$0]  %s20_s26, 23296, %s22_s28, [#allocation3], %s2880_s29, %s2880_s29, %s2881_s30  }
   0x4   :  { %2877 = dma.done.wait [#allocation3], 23296  }
   0x5   :  { %2878 = vsyncadd [#allocation3], 4294944000  ;;  %v1885_v0 = vld [vmem:[#allocation2 + $0x70] sm:$0xf]  ;;  %v2654_v1 = vld [vmem:[#allocation2 + $0x74] sm:$0xf0] }
   0x6   :  { %v1949_v2 = vld [vmem:[#allocation2 + $0xf0] sm:$0xf]  ;;  %v1886_v3 = vor.u32 %v2654_v1, %v1885_v0  ;;  %v2670_v4 = vld [vmem:[#allocation2 + $0xf4] sm:$0xf0]  ;;  %v1877_v11 = vld [vmem:[#allocation2 + $0x60] sm:$0xf] }
   0x7   :  { %v2013_v5 = vld [vmem:[#allocation2 + $0x170] sm:$0xf]  ;;  %v2686_v6 = vld [vmem:[#allocation2 + $0x174] sm:$0xf0]  ;;  %v1950_v7 = vor.u32 %v2670_v4, %v1949_v2  ;;  %v2652_v13 = vld [vmem:[#allocation2 + $0x64] sm:$0xf0] }
   0x8   :  { %v2014_v8 = vor.u32 %v2686_v6, %v2013_v5  ;;  %v2077_v9 = vld [vmem:[#allocation2 + $0x1f0] sm:$0xf]  ;;  %v2702_v10 = vld [vmem:[#allocation2 + $0x1f4] sm:$0xf0]  ;;  %1186 = vmatpush.bf16.msra.mxu0 %v1886_v3  ;;  %v1941_v14 = vld [vmem:[#allocation2 + $0xe0] sm:$0xf]  ;;  %v1878_v16 = vor.u32 %v2652_v13, %v1877_v11 }
   0x9   :  { %v2078_v12 = vor.u32 %v2702_v10, %v2077_v9  ;;  %v2668_v15 = vld [vmem:[#allocation2 + $0xe4] sm:$0xf0]  ;;  %1199 = vmatpush.bf16.msra.mxu1 %v1950_v7  ;;  %v2005_v18 = vld [vmem:[#allocation2 + $0x160] sm:$0xf]  ;;  %v1869_v23 = vld [vmem:[#allocation2 + $0x50] sm:$0xf] }
   0xa   :  { %1212 = vmatpush.bf16.msra.mxu2 %v2014_v8  ;;  %v1942_v17 = vor.u32 %v2668_v15, %v1941_v14  ;;  %v2684_v19 = vld [vmem:[#allocation2 + $0x164] sm:$0xf0]  ;;  %v2069_v20 = vld [vmem:[#allocation2 + $0x1e0] sm:$0xf]  ;;  %v2650_v24 = vld [vmem:[#allocation2 + $0x54] sm:$0xf0] }
   0xb   :  { %1225 = vmatpush.bf16.msra.mxu3 %v2078_v12  ;;  %v2006_v21 = vor.u32 %v2684_v19, %v2005_v18  ;;  %v2700_v22 = vld [vmem:[#allocation2 + $0x1e4] sm:$0xf0]  ;;  %v1933_v26 = vld [vmem:[#allocation2 + $0xd0] sm:$0xf]  ;;  %v2666_v27 = vld [vmem:[#allocation2 + $0xd4] sm:$0xf0]  ;;  %v1870_v29 = vor.u32 %v2650_v24, %v1869_v23 }
   0xc   :  { %v2070_v25 = vor.u32 %v2700_v22, %v2069_v20  ;;  %v1997_v28 = vld [vmem:[#allocation2 + $0x150] sm:$0xf]  ;;  %1187 = vmatpush.bf16.msra.mxu0 %v1878_v16  ;;  %v2682_v30 = vld [vmem:[#allocation2 + $0x154] sm:$0xf0]  ;;  %v1934_v33 = vor.u32 %v2666_v27, %v1933_v26  ;;  %v1861_v35 = vld [vmem:[#allocation2 + $0x40] sm:$0xf] }
   0xd   :  { %v2061_v31 = vld [vmem:[#allocation2 + $0x1d0] sm:$0xf]  ;;  %v2698_v32 = vld [vmem:[#allocation2 + $0x1d4] sm:$0xf0]  ;;  %1200 = vmatpush.bf16.msra.mxu1 %v1942_v17  ;;  %v1998_v34 = vor.u32 %v2682_v30, %v1997_v28  ;;  %v2648_v36 = vld [vmem:[#allocation2 + $0x44] sm:$0xf0] }
   0xe   :  { %1213 = vmatpush.bf16.msra.mxu2 %v2006_v21  ;;  %v1925_v37 = vld [vmem:[#allocation2 + $0xc0] sm:$0xf]  ;;  %v2062_v38 = vor.u32 %v2698_v32, %v2061_v31  ;;  %v2664_v39 = vld [vmem:[#allocation2 + $0xc4] sm:$0xf0]  ;;  %v1862_v44 = vor.u32 %v2648_v36, %v1861_v35  ;;  %v1853_v47 = vld [vmem:[#allocation2 + $0x30] sm:$0xf] }
   0xf   :  { %1226 = vmatpush.bf16.msra.mxu3 %v2070_v25  ;;  %v1989_v40 = vld [vmem:[#allocation2 + $0x140] sm:$0xf]  ;;  %v2680_v41 = vld [vmem:[#allocation2 + $0x144] sm:$0xf0]  ;;  %v1926_v45 = vor.u32 %v2664_v39, %v1925_v37  ;;  %v2646_v48 = vld [vmem:[#allocation2 + $0x34] sm:$0xf0] }
  0x10   :  { %v2053_v42 = vld [vmem:[#allocation2 + $0x1c0] sm:$0xf]  ;;  %v2696_v43 = vld [vmem:[#allocation2 + $0x1c4] sm:$0xf0]  ;;  %1188 = vmatpush.bf16.msra.mxu0 %v1870_v29  ;;  %v1990_v46 = vor.u32 %v2680_v41, %v1989_v40  ;;  %v1917_v49 = vld [vmem:[#allocation2 + $0xb0] sm:$0xf]  ;;  %v1854_v56 = vor.u32 %v2646_v48, %v1853_v47 }
  0x11   :  { %1201 = vmatpush.bf16.msra.mxu1 %v1934_v33  ;;  %v2054_v50 = vor.u32 %v2696_v43, %v2053_v42  ;;  %v2662_v51 = vld [vmem:[#allocation2 + $0xb4] sm:$0xf0]  ;;  %v1981_v52 = vld [vmem:[#allocation2 + $0x130] sm:$0xf]  ;;  %v1845_v59 = vld [vmem:[#allocation2 + $0x20] sm:$0xf] }
  0x12   :  { %1214 = vmatpush.bf16.msra.mxu2 %v1998_v34  ;;  %v2678_v53 = vld [vmem:[#allocation2 + $0x134] sm:$0xf0]  ;;  %v2045_v54 = vld [vmem:[#allocation2 + $0x1b0] sm:$0xf]  ;;  %v1918_v57 = vor.u32 %v2662_v51, %v1917_v49  ;;  %v2644_v60 = vld [vmem:[#allocation2 + $0x24] sm:$0xf0] }
  0x13   :  { %1227 = vmatpush.bf16.msra.mxu3 %v2062_v38  ;;  %v2694_v55 = vld [vmem:[#allocation2 + $0x1b4] sm:$0xf0]  ;;  %v1982_v58 = vor.u32 %v2678_v53, %v1981_v52  ;;  %v1909_v61 = vld [vmem:[#allocation2 + $0xa0] sm:$0xf]  ;;  %v2660_v63 = vld [vmem:[#allocation2 + $0xa4] sm:$0xf0]  ;;  %v1846_v4 = vor.u32 %v2644_v60, %v1845_v59 }
  0x14   :  { %1189 = vmatpush.bf16.msra.mxu0 %v1862_v44  ;;  %v2046_v62 = vor.u32 %v2694_v55, %v2045_v54  ;;  %v1973_v0 = vld [vmem:[#allocation2 + $0x120] sm:$0xf]  ;;  %v2676_v1 = vld [vmem:[#allocation2 + $0x124] sm:$0xf0]  ;;  %v1910_v5 = vor.u32 %v2660_v63, %v1909_v61  ;;  %v1837_v7 = vld [vmem:[#allocation2 + $0x10] sm:$0xf] }
  0x15   :  { %1202 = vmatpush.bf16.msra.mxu1 %v1926_v45  ;;  %v2037_v2 = vld [vmem:[#allocation2 + $0x1a0] sm:$0xf]  ;;  %v2692_v3 = vld [vmem:[#allocation2 + $0x1a4] sm:$0xf0]  ;;  %v1974_v6 = vor.u32 %v2676_v1, %v1973_v0  ;;  %v2642_v8 = vld [vmem:[#allocation2 + $0x14] sm:$0xf0] }
  0x16   :  { %1215 = vmatpush.bf16.msra.mxu2 %v1990_v46  ;;  %v1901_v9 = vld [vmem:[#allocation2 + $0x90] sm:$0xf]  ;;  %v2038_v10 = vor.u32 %v2692_v3, %v2037_v2  ;;  %v2658_v11 = vld [vmem:[#allocation2 + $0x94] sm:$0xf0]  ;;  %v1838_v16 = vor.u32 %v2642_v8, %v1837_v7  ;;  %v1829_v17 = vld [vmem:[#allocation2] sm:$0xf] }
  0x17   :  { %1228 = vmatpush.bf16.msra.mxu3 %v2054_v50  ;;  %v1965_v12 = vld [vmem:[#allocation2 + $0x110] sm:$0xf]  ;;  %v2674_v13 = vld [vmem:[#allocation2 + $0x114] sm:$0xf0]  ;;  %v2640_v18 = vld [vmem:[#allocation2 + $0x4] sm:$0xf0]  ;;  %v1902_v19 = vor.u32 %v2658_v11, %v1901_v9 }
  0x18   :  { %1190 = vmatpush.bf16.msra.mxu0 %v1854_v56  ;;  %v2029_v14 = vld [vmem:[#allocation2 + $0x190] sm:$0xf]  ;;  %v2690_v15 = vld [vmem:[#allocation2 + $0x194] sm:$0xf0]  ;;  %v1966_v20 = vor.u32 %v2674_v13, %v1965_v12  ;;  %v1893_v21 = vld [vmem:[#allocation2 + $0x80] sm:$0xf]  ;;  %v1830_v31 = vor.u32 %v2640_v18, %v1829_v17 }
  0x19   :  { %1203 = vmatpush.bf16.msra.mxu1 %v1918_v57  ;;  %v2656_v22 = vld [vmem:[#allocation2 + $0x84] sm:$0xf0]  ;;  %v1957_v23 = vld [vmem:[#allocation2 + $0x100] sm:$0xf]  ;;  %v2030_v24 = vor.u32 %v2690_v15, %v2029_v14  ;;  %v2141_v28 = vld [vmem:[#allocation2 + $0x270] sm:$0xf] }
  0x1a   :  { %1216 = vmatpush.bf16.msra.mxu2 %v1982_v58  ;;  %v2672_v25 = vld [vmem:[#allocation2 + $0x104] sm:$0xf0]  ;;  %v2021_v26 = vld [vmem:[#allocation2 + $0x180] sm:$0xf]  ;;  %v2718_v29 = vld [vmem:[#allocation2 + $0x274] sm:$0xf0]  ;;  %v1894_v35 = vor.u32 %v2656_v22, %v1893_v21 }
  0x1b   :  { %1229 = vmatpush.bf16.msra.mxu3 %v2046_v62  ;;  %v2688_v27 = vld [vmem:[#allocation2 + $0x184] sm:$0xf0]  ;;  %v2205_v30 = vld [vmem:[#allocation2 + $0x2f0] sm:$0xf]  ;;  %v2734_v32 = vld [vmem:[#allocation2 + $0x2f4] sm:$0xf0]  ;;  %v1958_v36 = vor.u32 %v2672_v25, %v1957_v23  ;;  %v2142_v40 = vor.u32 %v2718_v29, %v2141_v28 }
  0x1c   :  { %1191 = vmatpush.bf16.msra.mxu0 %v1846_v4  ;;  %v2269_v33 = vld [vmem:[#allocation2 + $0x370] sm:$0xf]  ;;  %v2750_v34 = vld [vmem:[#allocation2 + $0x374] sm:$0xf0]  ;;  %v2022_v39 = vor.u32 %v2688_v27, %v2021_v26  ;;  %v2206_v41 = vor.u32 %v2734_v32, %v2205_v30  ;;  %v2133_v43 = vld [vmem:[#allocation2 + $0x260] sm:$0xf] }
  0x1d   :  { %1204 = vmatpush.bf16.msra.mxu1 %v1910_v5  ;;  %v2333_v37 = vld [vmem:[#allocation2 + $0x3f0] sm:$0xf]  ;;  %v2766_v38 = vld [vmem:[#allocation2 + $0x3f4] sm:$0xf0]  ;;  %v2270_v42 = vor.u32 %v2750_v34, %v2269_v33  ;;  %v2716_v44 = vld [vmem:[#allocation2 + $0x264] sm:$0xf0] }
  0x1e   :  { %1217 = vmatpush.bf16.msra.mxu2 %v1974_v6  ;;  %v2197_v45 = vld [vmem:[#allocation2 + $0x2e0] sm:$0xf]  ;;  %v2334_v46 = vor.u32 %v2766_v38, %v2333_v37  ;;  %v2732_v47 = vld [vmem:[#allocation2 + $0x2e4] sm:$0xf0]  ;;  %v2134_v52 = vor.u32 %v2716_v44, %v2133_v43  ;;  %v2125_v53 = vld [vmem:[#allocation2 + $0x250] sm:$0xf] }
  0x1f   :  { %1230 = vmatpush.bf16.msra.mxu3 %v2038_v10  ;;  %v2261_v48 = vld [vmem:[#allocation2 + $0x360] sm:$0xf]  ;;  %v2748_v49 = vld [vmem:[#allocation2 + $0x364] sm:$0xf0]  ;;  %v2714_v54 = vld [vmem:[#allocation2 + $0x254] sm:$0xf0]  ;;  %v2198_v55 = vor.u32 %v2732_v47, %v2197_v45 }
  0x20   :  { %1192 = vmatpush.bf16.msra.mxu0 %v1838_v16  ;;  %v2325_v50 = vld [vmem:[#allocation2 + $0x3e0] sm:$0xf]  ;;  %v2764_v51 = vld [vmem:[#allocation2 + $0x3e4] sm:$0xf0]  ;;  %v2262_v56 = vor.u32 %v2748_v49, %v2261_v48  ;;  %v2189_v57 = vld [vmem:[#allocation2 + $0x2d0] sm:$0xf]  ;;  %v2126_v6 = vor.u32 %v2714_v54, %v2125_v53 }
  0x21   :  { %1205 = vmatpush.bf16.msra.mxu1 %v1902_v19  ;;  %v2730_v58 = vld [vmem:[#allocation2 + $0x2d4] sm:$0xf0]  ;;  %v44_v59 = vld [vmem:[%s3086_s0 + $0x8] sm:$0xff]  ;;  %v2326_v60 = vor.u32 %v2764_v51, %v2325_v50  ;;  %v2253_v61 = vld [vmem:[#allocation2 + $0x350] sm:$0xf]  ;;  %vm1182_vm0 = vcmask 392192  }
  0x22   :  { %1218 = vmatpush.bf16.msra.mxu2 %v1966_v20  ;;  %v2746_v62 = vld [vmem:[#allocation2 + $0x354] sm:$0xf0]  ;;  %v239_v63 = vunpack.c.l.b16 %v44_v59  ;;  %v43_v0 = vld [vmem:[%s3086_s0] sm:$0xff]  ;;  %v240_v1 = vunpack.c.h.b16 %v44_v59  ;;  %v2317_v2 = vld [vmem:[#allocation2 + $0x3d0] sm:$0xf]  ;;  %v2190_v9 = vor.u32 %v2730_v58, %v2189_v57  ;;  %vm1729_vm7 = vcmask 523264  }
  0x23   :  { %1231 = vmatpush.bf16.msra.mxu3 %v2030_v24  ;;  %v2762_v3 = vld [vmem:[#allocation2 + $0x3d4] sm:$0xf0]  ;;  %v237_v4 = vunpack.c.l.b16 %v43_v0  ;;  %v238_v5 = vunpack.c.h.b16 %v43_v0  ;;  %v2254_v10 = vor.u32 %v2746_v62, %v2253_v61  ;;  %v2117_v11 = vld [vmem:[#allocation2 + $0x240] sm:$0xf]  ;;  %v2712_v12 = vld [vmem:[#allocation2 + $0x244] sm:$0xf0] }
  0x24   :  { %1193 = vmatpush.bf16.msra.mxu0 %v1830_v31  ;;  %v2931_v7 = vpack.c.b16 %v239_v63, %v239_v63  ;;  %v2933_v8 = vpack.c.b16 %v240_v1, %v240_v1  ;;  %v2181_v13 = vld [vmem:[#allocation2 + $0x2c0] sm:$0xf]  ;;  %v2318_v15 = vor.u32 %v2762_v3, %v2317_v2  ;;  %v2728_v16 = vld [vmem:[#allocation2 + $0x2c4] sm:$0xf0]  ;;  %v2118_v22 = vor.u32 %v2712_v12, %v2117_v11  ;;  %v2109_v25 = vld [vmem:[#allocation2 + $0x230] sm:$0xf] }
  0x25   :  { %1206 = vmatpush.bf16.msra.mxu1 %v1894_v35  ;;  %v2935_v14 = vpack.c.b16 %v237_v4, %v237_v4  ;;  %v2245_v17 = vld [vmem:[#allocation2 + $0x340] sm:$0xf]  ;;  %v2744_v18 = vld [vmem:[#allocation2 + $0x344] sm:$0xf0]  ;;  %v2938_v19 = vpack.c.b16 %v238_v5, %v238_v5  ;;  %v2182_v23 = vor.u32 %v2728_v16, %v2181_v13  ;;  %v2710_v26 = vld [vmem:[#allocation2 + $0x234] sm:$0xf0] }
  0x26   :  { %1219 = vmatpush.bf16.msra.mxu2 %v1958_v36  ;;  %v2309_v20 = vld [vmem:[#allocation2 + $0x3c0] sm:$0xf]  ;;  %v2760_v21 = vld [vmem:[#allocation2 + $0x3c4] sm:$0xf0]  ;;  %v2246_v24 = vor.u32 %v2744_v18, %v2245_v17  ;;  %v2173_v27 = vld [vmem:[#allocation2 + $0x2b0] sm:$0xf]  ;;  %v2110_v34 = vor.u32 %v2710_v26, %v2109_v25 }
  0x27   :  { %1232 = vmatpush.bf16.msra.mxu3 %v2022_v39  ;;  %1194 = vmatmul.bf16.vlgmr.msra.gmra.mxu0 %v2935_v14  ;;  %v2310_v28 = vor.u32 %v2760_v21, %v2309_v20  ;;  %v2726_v29 = vld [vmem:[#allocation2 + $0x2b4] sm:$0xf0]  ;;  %v2237_v30 = vld [vmem:[#allocation2 + $0x330] sm:$0xf]  ;;  %v2101_v37 = vld [vmem:[#allocation2 + $0x220] sm:$0xf] }
  0x28   :  { %1238 = vmatpush.bf16.msrb.mxu0 %v2142_v40  ;;  %1207 = vmatmul.bf16.vlgmr.msra.gmra.mxu1 %v2938_v19  ;;  %v2742_v31 = vld [vmem:[#allocation2 + $0x334] sm:$0xf0]  ;;  %v2301_v32 = vld [vmem:[#allocation2 + $0x3b0] sm:$0xf]  ;;  %v2174_v35 = vor.u32 %v2726_v29, %v2173_v27  ;;  %v2708_v38 = vld [vmem:[#allocation2 + $0x224] sm:$0xf0] }
  0x29   :  { %1251 = vmatpush.bf16.msrb.mxu1 %v2206_v41  ;;  %1220 = vmatmul.bf16.vlgmr.msra.gmra.mxu2 %v2931_v7  ;;  %v2758_v33 = vld [vmem:[#allocation2 + $0x3b4] sm:$0xf0]  ;;  %v2238_v36 = vor.u32 %v2742_v31, %v2237_v30  ;;  %v2165_v39 = vld [vmem:[#allocation2 + $0x2a0] sm:$0xf]  ;;  %v2724_v41 = vld [vmem:[#allocation2 + $0x2a4] sm:$0xf0] }
  0x2a   :  { %1264 = vmatpush.bf16.msrb.mxu2 %v2270_v42  ;;  %1233 = vmatmul.bf16.vlgmr.msra.gmra.mxu3 %v2933_v8  ;;  %v2302_v40 = vor.u32 %v2758_v33, %v2301_v32  ;;  %v2229_v42 = vld [vmem:[#allocation2 + $0x320] sm:$0xf]  ;;  %v2740_v43 = vld [vmem:[#allocation2 + $0x324] sm:$0xf0]  ;;  %v2166_v47 = vor.u32 %v2724_v41, %v2165_v39  ;;  %v2093_v49 = vld [vmem:[#allocation2 + $0x210] sm:$0xf] }
  0x2b   :  { %1277 = vmatpush.bf16.msrb.mxu3 %v2334_v46  ;;  %v2293_v44 = vld [vmem:[#allocation2 + $0x3a0] sm:$0xf]  ;;  %v2756_v45 = vld [vmem:[#allocation2 + $0x3a4] sm:$0xf0]  ;;  %v2102_v46 = vor.u32 %v2708_v38, %v2101_v37  ;;  %v2230_v48 = vor.u32 %v2740_v43, %v2229_v42  ;;  %v2706_v50 = vld [vmem:[#allocation2 + $0x214] sm:$0xf0] }
  0x2c   :  { %1239 = vmatpush.bf16.msrb.mxu0 %v2134_v52  ;;  %v2157_v51 = vld [vmem:[#allocation2 + $0x290] sm:$0xf]  ;;  %v2294_v52 = vor.u32 %v2756_v45, %v2293_v44  ;;  %v2722_v53 = vld [vmem:[#allocation2 + $0x294] sm:$0xf0]  ;;  %v2085_v58 = vld [vmem:[#allocation2 + $0x200] sm:$0xf]  ;;  %v2094_v59 = vor.u32 %v2706_v50, %v2093_v49 }
  0x2d   :  { %1252 = vmatpush.bf16.msrb.mxu1 %v2198_v55  ;;  %v2221_v54 = vld [vmem:[#allocation2 + $0x310] sm:$0xf]  ;;  %v2738_v55 = vld [vmem:[#allocation2 + $0x314] sm:$0xf0]  ;;  %v2149_v61 = vld [vmem:[#allocation2 + $0x280] sm:$0xf]  ;;  %v2158_v63 = vor.u32 %v2722_v53, %v2157_v51 }
  0x2e   :  { %1265 = vmatpush.bf16.msrb.mxu2 %v2262_v56  ;;  %v2285_v56 = vld [vmem:[#allocation2 + $0x390] sm:$0xf]  ;;  %v2754_v57 = vld [vmem:[#allocation2 + $0x394] sm:$0xf0]  ;;  %v2720_v62 = vld [vmem:[#allocation2 + $0x284] sm:$0xf0]  ;;  %v2222_v0 = vor.u32 %v2738_v55, %v2221_v54 }
  0x2f   :  { %1278 = vmatpush.bf16.msrb.mxu3 %v2326_v60  ;;  %v2704_v60 = vld [vmem:[#allocation2 + $0x204] sm:$0xf0]  ;;  %v2213_v1 = vld [vmem:[#allocation2 + $0x300] sm:$0xf]  ;;  %v46_v3 = vld [vmem:[%s3086_s0 + $0x18] sm:$0xff]  ;;  %v2286_v4 = vor.u32 %v2754_v57, %v2285_v56  ;;  %v2150_v20 = vor.u32 %v2720_v62, %v2149_v61  ;;  %vm1820_vm11 = vcmask 15360  }
  0x30   :  { %1240 = vmatpush.bf16.msrb.mxu0 %v2126_v6  ;;  %v2736_v2 = vld [vmem:[#allocation2 + $0x304] sm:$0xf0]  ;;  %v2277_v5 = vld [vmem:[#allocation2 + $0x380] sm:$0xf]  ;;  %v2782_v11 = vld [vmem:[#allocation2 + $0x474] sm:$0xf0]  ;;  %v2086_v13 = vor.u32 %v2704_v60, %v2085_v58  ;;  %v243_v18 = vunpack.c.l.b16 %v46_v3  ;;  %v244_v25 = vunpack.c.h.b16 %v46_v3 }
  0x31   :  { %1253 = vmatpush.bf16.msrb.mxu1 %v2190_v9  ;;  %v2752_v6 = vld [vmem:[#allocation2 + $0x384] sm:$0xf0]  ;;  %v45_v9 = vld [vmem:[%s3086_s0 + $0x10] sm:$0xff]  ;;  %v2814_v17 = vld [vmem:[#allocation2 + $0x574] sm:$0xf0]  ;;  %v2214_v21 = vor.u32 %v2736_v2, %v2213_v1 }
  0x32   :  { %1266 = vmatpush.bf16.msrb.mxu2 %v2254_v10  ;;  %v2397_v10 = vld [vmem:[#allocation2 + $0x470] sm:$0xf]  ;;  %v2278_v26 = vor.u32 %v2752_v6, %v2277_v5  ;;  %v2389_v31 = vld [vmem:[#allocation2 + $0x460] sm:$0xf]  ;;  %v2780_v32 = vld [vmem:[#allocation2 + $0x464] sm:$0xf0]  ;;  %v2953_v42 = vpack.c.b16 %v244_v25, %v244_v25 }
  0x33   :  { %1279 = vmatpush.bf16.msrb.mxu3 %v2318_v15  ;;  %v2461_v12 = vld [vmem:[#allocation2 + $0x4f0] sm:$0xf]  ;;  %v2798_v15 = vld [vmem:[#allocation2 + $0x4f4] sm:$0xf0]  ;;  %v2398_v27 = vor.u32 %v2782_v11, %v2397_v10  ;;  %v2453_v33 = vld [vmem:[#allocation2 + $0x4e0] sm:$0xf]  ;;  %v2390_v43 = vor.u32 %v2780_v32, %v2389_v31 }
  0x34   :  { %1241 = vmatpush.bf16.msrb.mxu0 %v2118_v22  ;;  %v2525_v16 = vld [vmem:[#allocation2 + $0x570] sm:$0xf]  ;;  %v2549_v22 = vld [vmem:[#allocation2 + $0x5a0] sm:$0xf]  ;;  %v2462_v29 = vor.u32 %v2798_v15, %v2461_v12  ;;  %v2812_v38 = vld [vmem:[#allocation2 + $0x564] sm:$0xf0] }
  0x35   :  { %1254 = vmatpush.bf16.msrb.mxu1 %v2182_v23  ;;  %v2820_v23 = vld [vmem:[#allocation2 + $0x5a4] sm:$0xf0]  ;;  %v2526_v30 = vor.u32 %v2814_v17, %v2525_v16  ;;  %v2517_v37 = vld [vmem:[#allocation2 + $0x560] sm:$0xf]  ;;  %v2541_v39 = vld [vmem:[#allocation2 + $0x590] sm:$0xf] }
  0x36   :  { %1267 = vmatpush.bf16.msrb.mxu2 %v2246_v24  ;;  %v241_v24 = vunpack.c.l.b16 %v45_v9  ;;  %v2445_v49 = vld [vmem:[#allocation2 + $0x4d0] sm:$0xf]  ;;  %v2794_v51 = vld [vmem:[#allocation2 + $0x4d4] sm:$0xf0]  ;;  %v2533_v54 = vld [vmem:[#allocation2 + $0x580] sm:$0xf] }
  0x37   :  { %1280 = vmatpush.bf16.msrb.mxu3 %v2310_v28  ;;  %v242_v28 = vunpack.c.h.b16 %v45_v9  ;;  %v2810_v53 = vld [vmem:[#allocation2 + $0x554] sm:$0xf0]  ;;  %v2816_v55 = vld [vmem:[#allocation2 + $0x584] sm:$0xf0]  ;;  %v2653_v57 = vld [vmem:[#allocation2 + $0x74] sm:$0xf] }
  0x38   :  { %1242 = vmatpush.bf16.msrb.mxu0 %v2110_v34  ;;  %v2550_v34 = vor.u32 %v2820_v23, %v2549_v22  ;;  %v2951_v41 = vpack.c.b16 %v241_v24, %v241_v24  ;;  %v1887_v58 = vld [vmem:[#allocation2 + $0x78] sm:$0xf0]  ;;  %v2373_v61 = vld [vmem:[#allocation2 + $0x440] sm:$0xf]  ;;  %v2776_v62 = vld [vmem:[#allocation2 + $0x444] sm:$0xf0] }
  0x39   :  { %1255 = vmatpush.bf16.msrb.mxu1 %v2174_v35  ;;  %v2949_v35 = vpack.c.b16 %v243_v18, %v243_v18  ;;  %v2955_v44 = vpack.c.b16 %v242_v28, %v242_v28  ;;  %v2792_v1 = vld [vmem:[#allocation2 + $0x4c4] sm:$0xf0]  ;;  %v2501_v2 = vld [vmem:[#allocation2 + $0x540] sm:$0xf]  ;;  %v2374_v5 = vor.u32 %v2776_v62, %v2373_v61  ;;  %v2651_v6 = vld [vmem:[#allocation2 + $0x64] sm:$0xf] }
  0x3a   :  { %1268 = vmatpush.bf16.msrb.mxu2 %v2238_v36  ;;  %v2796_v36 = vld [vmem:[#allocation2 + $0x4e4] sm:$0xf0]  ;;  %v1879_v9 = vld [vmem:[#allocation2 + $0x68] sm:$0xf0]  ;;  %v2365_v12 = vld [vmem:[#allocation2 + $0x430] sm:$0xf] }
  0x3b   :  { %1281 = vmatpush.bf16.msrb.mxu3 %v2302_v40  ;;  %v2818_v40 = vld [vmem:[#allocation2 + $0x594] sm:$0xf0]  ;;  %v2454_v45 = vor.u32 %v2796_v36, %v2453_v33  ;;  %v2808_v3 = vld [vmem:[#allocation2 + $0x544] sm:$0xf0]  ;;  %v2429_v15 = vld [vmem:[#allocation2 + $0x4b0] sm:$0xf] }
  0x3c   :  { %1243 = vmatpush.bf16.msrb.mxu0 %v2102_v46  ;;  %v2518_v46 = vor.u32 %v2812_v38, %v2517_v37  ;;  %v2542_v50 = vor.u32 %v2818_v40, %v2541_v39  ;;  %v2502_v11 = vor.u32 %v2808_v3, %v2501_v2  ;;  %v2790_v16 = vld [vmem:[#allocation2 + $0x4b4] sm:$0xf0]  ;;  %v2493_v17 = vld [vmem:[#allocation2 + $0x530] sm:$0xf]  ;;  %v2649_v23 = vld [vmem:[#allocation2 + $0x54] sm:$0xf] }
  0x3d   :  { %1256 = vmatpush.bf16.msrb.mxu1 %v2166_v47  ;;  %v2381_v47 = vld [vmem:[#allocation2 + $0x450] sm:$0xf]  ;;  %v2806_v18 = vld [vmem:[#allocation2 + $0x534] sm:$0xf0]  ;;  %v1871_v24 = vld [vmem:[#allocation2 + $0x58] sm:$0xf0] }
  0x3e   :  { %1269 = vmatpush.bf16.msrb.mxu2 %v2230_v48  ;;  %v2778_v48 = vld [vmem:[#allocation2 + $0x454] sm:$0xf0]  ;;  %v2357_v28 = vld [vmem:[#allocation2 + $0x420] sm:$0xf]  ;;  %v2788_v31 = vld [vmem:[#allocation2 + $0x4a4] sm:$0xf0] }
  0x3f   :  { %1282 = vmatpush.bf16.msrb.mxu3 %v2294_v52  ;;  %v2509_v52 = vld [vmem:[#allocation2 + $0x550] sm:$0xf]  ;;  %v2382_v56 = vor.u32 %v2778_v48, %v2381_v47  ;;  %v2485_v32 = vld [vmem:[#allocation2 + $0x520] sm:$0xf]  ;;  %v2804_v33 = vld [vmem:[#allocation2 + $0x524] sm:$0xf0] }
  0x40   :  { %1244 = vmatpush.bf16.msrb.mxu0 %v2094_v59  ;;  %v2446_v59 = vor.u32 %v2794_v51, %v2445_v49  ;;  %v2510_v60 = vor.u32 %v2810_v53, %v2509_v52  ;;  %v2647_v36 = vld [vmem:[#allocation2 + $0x44] sm:$0xf]  ;;  %v1863_v38 = vld [vmem:[#allocation2 + $0x48] sm:$0xf0]  ;;  %v2349_v39 = vld [vmem:[#allocation2 + $0x410] sm:$0xf] }
  0x41   :  { %1257 = vmatpush.bf16.msrb.mxu1 %v2158_v63  ;;  %v2437_v63 = vld [vmem:[#allocation2 + $0x4c0] sm:$0xf]  ;;  %v2770_v40 = vld [vmem:[#allocation2 + $0x414] sm:$0xf0]  ;;  %v2413_v47 = vld [vmem:[#allocation2 + $0x490] sm:$0xf]  ;;  %v1866_v52 = vor.u32 %v2647_v36, %v1863_v38 }
  0x42   :  { %1270 = vmatpush.bf16.msrb.mxu2 %v2222_v0  ;;  %v2534_v0 = vor.u32 %v2816_v55, %v2533_v54  ;;  %v2438_v10 = vor.u32 %v2792_v1, %v2437_v63  ;;  %v2786_v48 = vld [vmem:[#allocation2 + $0x494] sm:$0xf0]  ;;  %v2477_v49 = vld [vmem:[#allocation2 + $0x510] sm:$0xf]  ;;  %v2645_v51 = vld [vmem:[#allocation2 + $0x34] sm:$0xf]  ;;  %v2350_v55 = vor.u32 %v2770_v40, %v2349_v39 }
  0x43   :  { %1283 = vmatpush.bf16.msrb.mxu3 %v2286_v4  ;;  %v1890_v4 = vor.u32 %v2653_v57, %v1887_v58  ;;  %v1855_v53 = vld [vmem:[#allocation2 + $0x38] sm:$0xf0]  ;;  %v2341_v54 = vld [vmem:[#allocation2 + $0x400] sm:$0xf]  ;;  %v2784_v58 = vld [vmem:[#allocation2 + $0x484] sm:$0xf0] }
  0x44   :  { %1245 = vmatpush.bf16.msrb.mxu0 %v2086_v13  ;;  %v2774_v13 = vld [vmem:[#allocation2 + $0x434] sm:$0xf0]  ;;  %v2405_v57 = vld [vmem:[#allocation2 + $0x480] sm:$0xf]  ;;  %v2800_v62 = vld [vmem:[#allocation2 + $0x504] sm:$0xf0]  ;;  %v1858_v3 = vor.u32 %v2645_v51, %v1855_v53 }
  0x45   :  { %1258 = vmatpush.bf16.msrb.mxu1 %v2150_v20  ;;  %v1882_v20 = vor.u32 %v2651_v6, %v1879_v9  ;;  %v2366_v22 = vor.u32 %v2774_v13, %v2365_v12  ;;  %v2469_v61 = vld [vmem:[#allocation2 + $0x500] sm:$0xf]  ;;  %v2669_v1 = vld [vmem:[#allocation2 + $0xf4] sm:$0xf]  ;;  %v1951_v2 = vld [vmem:[#allocation2 + $0xf8] sm:$0xf0] }
  0x46   :  { %1271 = vmatpush.bf16.msrb.mxu2 %v2214_v21  ;;  %v2964_v21 = vld [vmem:[%s3086_s0 + $0x28] sm:$0xff]  ;;  %v47_v63 = vld [vmem:[%s3086_s0 + $0x20] sm:$0xff]  ;;  %v2665_v38 = vld [vmem:[#allocation2 + $0xd4] sm:$0xf] }
  0x47   :  { %1284 = vmatpush.bf16.msrb.mxu3 %v2278_v26  ;;  %1246 = vmatmul.bf16.vlgmr.msrb.gmra.mxu0 %v2951_v41  ;;  %v248_v25 = vunpack.c.h.b16 %v2964_v21  ;;  %v2430_v26 = vor.u32 %v2790_v16, %v2429_v15  ;;  %v1847_v9 = vld [vmem:[#allocation2 + $0x28] sm:$0xf0]  ;;  %v245_v12 = vunpack.c.l.b16 %v47_v63  ;;  %v247_v13 = vunpack.c.l.b16 %v2964_v21  ;;  %v1839_v21 = vld [vmem:[#allocation2 + $0x18] sm:$0xf0]  ;;  %v2717_v51 = vld [vmem:[#allocation2 + $0x274] sm:$0xf] }
  0x48   :  { %1290 = vmatpush.bf16.msra.mxu0 %v2398_v27  ;;  %1259 = vmatmul.bf16.vlgmr.msrb.gmra.mxu1 %v2955_v44  ;;  %v2494_v27 = vor.u32 %v2806_v18, %v2493_v17  ;;  %v2406_v15 = vor.u32 %v2784_v58, %v2405_v57  ;;  %v2470_v16 = vor.u32 %v2800_v62, %v2469_v61  ;;  %v246_v17 = vunpack.c.h.b16 %v47_v63  ;;  %v1927_v58 = vld [vmem:[#allocation2 + $0xc8] sm:$0xf0]  ;;  %v2695_v62 = vld [vmem:[#allocation2 + $0x1c4] sm:$0xf] }
  0x49   :  { %1303 = vmatpush.bf16.msra.mxu1 %v2462_v29  ;;  %1272 = vmatmul.bf16.vlgmr.msrb.gmra.mxu2 %v2949_v35  ;;  %v2772_v29 = vld [vmem:[#allocation2 + $0x424] sm:$0xf0]  ;;  %v1954_v18 = vor.u32 %v2669_v1, %v1951_v2  ;;  %v2055_v63 = vld [vmem:[#allocation2 + $0x1c8] sm:$0xf0] }
  0x4a   :  { %1316 = vmatpush.bf16.msra.mxu2 %v2526_v30  ;;  %1285 = vmatmul.bf16.vlgmr.msrb.gmra.mxu3 %v2953_v42  ;;  %v2421_v30 = vld [vmem:[#allocation2 + $0x4a0] sm:$0xf]  ;;  %v2358_v37 = vor.u32 %v2772_v29, %v2357_v28  ;;  %v2007_v28 = vld [vmem:[#allocation2 + $0x168] sm:$0xf0]  ;;  %v2975_v29 = vpack.c.b16 %v245_v12, %v245_v12  ;;  %v2693_v12 = vld [vmem:[#allocation2 + $0x1b4] sm:$0xf] }
  0x4b   :  { %1334 = vmatpush.bf16.msra.mxu3 %v2550_v34  ;;  %v1874_v34 = vor.u32 %v2649_v23, %v1871_v24  ;;  %v2667_v23 = vld [vmem:[#allocation2 + $0xe4] sm:$0xf]  ;;  %v2135_v1 = vld [vmem:[#allocation2 + $0x268] sm:$0xf0] }
  0x4c   :  { %1291 = vmatpush.bf16.msra.mxu0 %v2390_v43  ;;  %v2967_v43 = vpack.c.b16 %v248_v25, %v248_v25 }
  0x4d   :  { %1304 = vmatpush.bf16.msra.mxu1 %v2454_v45  ;;  %v2422_v45 = vor.u32 %v2788_v31, %v2421_v30  ;;  %v2977_v30 = vpack.c.b16 %v247_v13, %v247_v13  ;;  %v2699_v31 = vld [vmem:[#allocation2 + $0x1e4] sm:$0xf]  ;;  %v2047_v13 = vld [vmem:[#allocation2 + $0x1b8] sm:$0xf0] }
  0x4e   :  { %1317 = vmatpush.bf16.msra.mxu2 %v2518_v46  ;;  %v2486_v46 = vor.u32 %v2804_v33, %v2485_v32  ;;  %v2071_v32 = vld [vmem:[#allocation2 + $0x1e8] sm:$0xf0]  ;;  %v2979_v33 = vpack.c.b16 %v246_v17, %v246_v17 }
  0x4f   :  { %1335 = vmatpush.bf16.msra.mxu3 %v2542_v50  ;;  %v2802_v50 = vld [vmem:[#allocation2 + $0x514] sm:$0xf0]  ;;  %v2074_v40 = vor.u32 %v2699_v31, %v2071_v32  ;;  %v2119_v31 = vld [vmem:[#allocation2 + $0x248] sm:$0xf0] }
  0x50   :  { %1292 = vmatpush.bf16.msra.mxu0 %v2382_v56  ;;  %v2768_v56 = vld [vmem:[#allocation2 + $0x404] sm:$0xf0] }
  0x51   :  { %1305 = vmatpush.bf16.msra.mxu1 %v2446_v59  ;;  %v2414_v59 = vor.u32 %v2786_v48, %v2413_v47  ;;  %v2342_v6 = vor.u32 %v2768_v56, %v2341_v54  ;;  %v1999_v47 = vld [vmem:[#allocation2 + $0x158] sm:$0xf0]  ;;  %v1831_v48 = vld [vmem:[#allocation2 + $0x8] sm:$0xf0] }
  0x52   :  { %1318 = vmatpush.bf16.msra.mxu2 %v2510_v60  ;;  %v2478_v60 = vor.u32 %v2802_v50, %v2477_v49  ;;  %v2697_v49 = vld [vmem:[#allocation2 + $0x1d4] sm:$0xf]  ;;  %v2063_v50 = vld [vmem:[#allocation2 + $0x1d8] sm:$0xf0] }
  0x53   :  { %1336 = vmatpush.bf16.msra.mxu3 %v2534_v0  ;;  %v2643_v0 = vld [vmem:[#allocation2 + $0x24] sm:$0xf]  ;;  %v2066_v57 = vor.u32 %v2697_v49, %v2063_v50 }
  0x54   :  { %1293 = vmatpush.bf16.msra.mxu0 %v2374_v5  ;;  %v2015_v5 = vld [vmem:[#allocation2 + $0x178] sm:$0xf0]  ;;  %v1850_v24 = vor.u32 %v2643_v0, %v1847_v9  ;;  %v2715_v0 = vld [vmem:[#allocation2 + $0x264] sm:$0xf]  ;;  %v2677_v9 = vld [vmem:[#allocation2 + $0x134] sm:$0xf] }
  0x55   :  { %1306 = vmatpush.bf16.msra.mxu1 %v2438_v10  ;;  %v2701_v10 = vld [vmem:[#allocation2 + $0x1f4] sm:$0xf] }
  0x56   :  { %1319 = vmatpush.bf16.msra.mxu2 %v2502_v11  ;;  %v2079_v11 = vld [vmem:[#allocation2 + $0x1f8] sm:$0xf0] }
  0x57   :  { %1342 = vmatpush.bf16.msrb.mxu3 %v1890_v4  ;;  %v2685_v4 = vld [vmem:[#allocation2 + $0x174] sm:$0xf]  ;;  %v2082_v25 = vor.u32 %v2701_v10, %v2079_v11  ;;  %v1983_v10 = vld [vmem:[#allocation2 + $0x138] sm:$0xf0]  ;;  %v2138_v11 = vor.u32 %v2715_v0, %v2135_v1 }
  0x58   :  { %1294 = vmatpush.bf16.msra.mxu0 %v2366_v22  ;;  %v2641_v22 = vld [vmem:[#allocation2 + $0x14] sm:$0xf]  ;;  %v2271_v0 = vld [vmem:[#allocation2 + $0x378] sm:$0xf0] }
  0x59   :  { %1307 = vmatpush.bf16.msra.mxu1 %v2430_v26  ;;  %v1943_v26 = vld [vmem:[#allocation2 + $0xe8] sm:$0xf0]  ;;  %v1842_v39 = vor.u32 %v2641_v22, %v1839_v21  ;;  %v2050_v22 = vor.u32 %v2693_v12, %v2047_v13  ;;  %v2711_v21 = vld [vmem:[#allocation2 + $0x244] sm:$0xf] }
  0x5a   :  { %1320 = vmatpush.bf16.msra.mxu2 %v2494_v27  ;;  %2555 = vmatmul.msk.bf16.vlgmr.msra.gmra.mxu3 %vm1182_vm0, %v2967_v43  ;;  %v2683_v27 = vld [vmem:[#allocation2 + $0x164] sm:$0xf]  ;;  %v2199_v13 = vld [vmem:[#allocation2 + $0x2e8] sm:$0xf0] }
  0x5b   :  { %1343 = vmatpush.bf16.msrb.mxu3 %v1882_v20  ;;  %v2018_v20 = vor.u32 %v2685_v4, %v2015_v5  ;;  %v2010_v36 = vor.u32 %v2683_v27, %v2007_v28  ;;  %v2661_v4 = vld [vmem:[#allocation2 + $0xb4] sm:$0xf]  ;;  %v2058_v5 = vor.u32 %v2695_v62, %v2055_v63  ;;  %v2691_v27 = vld [vmem:[#allocation2 + $0x1a4] sm:$0xf]  ;;  %v2039_v28 = vld [vmem:[#allocation2 + $0x1a8] sm:$0xf0] }
  0x5c   :  { %1295 = vmatpush.bf16.msra.mxu0 %v2358_v37  ;;  %v2639_v37 = vld [vmem:[#allocation2 + $0x4] sm:$0xf]  ;;  %v2103_v62 = vld [vmem:[#allocation2 + $0x228] sm:$0xf0]  ;;  %v2749_v63 = vld [vmem:[#allocation2 + $0x374] sm:$0xf] }
  0x5d   :  { %1308 = vmatpush.bf16.msra.mxu1 %v2422_v45  ;;  %v1935_v45 = vld [vmem:[#allocation2 + $0xd8] sm:$0xf0]  ;;  %v1834_v56 = vor.u32 %v2639_v37, %v1831_v48  ;;  %v2042_v37 = vor.u32 %v2691_v27, %v2039_v28  ;;  %v2731_v12 = vld [vmem:[#allocation2 + $0x2e4] sm:$0xf]  ;;  %v2087_v27 = vld [vmem:[#allocation2 + $0x208] sm:$0xf0] }
  0x5e   :  { %1321 = vmatpush.bf16.msra.mxu2 %v2486_v46  ;;  %v2681_v46 = vld [vmem:[#allocation2 + $0x154] sm:$0xf]  ;;  %v1938_v53 = vor.u32 %v2665_v38, %v1935_v45  ;;  %v1903_v38 = vld [vmem:[#allocation2 + $0x98] sm:$0xf0]  ;;  %v2122_v45 = vor.u32 %v2711_v21, %v2119_v31 }
  0x5f   :  { %1344 = vmatpush.bf16.msrb.mxu3 %v1874_v34  ;;  %v1946_v34 = vor.u32 %v2667_v23, %v1943_v26  ;;  %v2002_v54 = vor.u32 %v2681_v46, %v1999_v47  ;;  %v1911_v23 = vld [vmem:[#allocation2 + $0xa8] sm:$0xf0]  ;;  %v2689_v46 = vld [vmem:[#allocation2 + $0x194] sm:$0xf]  ;;  %v2111_v48 = vld [vmem:[#allocation2 + $0x238] sm:$0xf0] }
  0x60   :  { %1296 = vmatpush.bf16.msra.mxu0 %v2350_v55  ;;  %v2663_v55 = vld [vmem:[#allocation2 + $0xc4] sm:$0xf]  ;;  %v2709_v47 = vld [vmem:[#allocation2 + $0x234] sm:$0xf]  ;;  %v2191_v21 = vld [vmem:[#allocation2 + $0x2d8] sm:$0xf0] }
  0x61   :  { %1309 = vmatpush.bf16.msra.mxu1 %v2414_v59  ;;  %v2679_v59 = vld [vmem:[#allocation2 + $0x144] sm:$0xf]  ;;  %v1930_v2 = vor.u32 %v2663_v55, %v1927_v58  ;;  %v1959_v55 = vld [vmem:[#allocation2 + $0x108] sm:$0xf0]  ;;  %v2114_v58 = vor.u32 %v2709_v47, %v2111_v48  ;;  %v2729_v28 = vld [vmem:[#allocation2 + $0x2d4] sm:$0xf] }
  0x62   :  { %1322 = vmatpush.bf16.msra.mxu2 %v2478_v60  ;;  %v1991_v60 = vld [vmem:[#allocation2 + $0x148] sm:$0xf0] }
  0x63   :  { %1345 = vmatpush.bf16.msrb.mxu3 %v1866_v52  ;;  %v2143_v52 = vld [vmem:[#allocation2 + $0x278] sm:$0xf0]  ;;  %v2183_v47 = vld [vmem:[#allocation2 + $0x2c8] sm:$0xf0] }
  0x64   :  { %1297 = vmatpush.bf16.msra.mxu0 %v2342_v6  ;;  %v2146_v61 = vor.u32 %v2717_v51, %v2143_v52  ;;  %v1919_v6 = vld [vmem:[#allocation2 + $0xb8] sm:$0xf0]  ;;  %v2655_v51 = vld [vmem:[#allocation2 + $0x84] sm:$0xf]  ;;  %v1895_v52 = vld [vmem:[#allocation2 + $0x88] sm:$0xf0] }
  0x65   :  { %1310 = vmatpush.bf16.msra.mxu1 %v2406_v15  ;;  %v2713_v15 = vld [vmem:[#allocation2 + $0x254] sm:$0xf]  ;;  %v1922_v17 = vor.u32 %v2661_v4, %v1919_v6  ;;  %v1898_v1 = vor.u32 %v2655_v51, %v1895_v52  ;;  %v2335_v4 = vld [vmem:[#allocation2 + $0x3f8] sm:$0xf0]  ;;  %v2759_v51 = vld [vmem:[#allocation2 + $0x3c4] sm:$0xf] }
  0x66   :  { %1323 = vmatpush.bf16.msra.mxu2 %v2470_v16  ;;  %v2127_v16 = vld [vmem:[#allocation2 + $0x258] sm:$0xf0]  ;;  %v2311_v52 = vld [vmem:[#allocation2 + $0x3c8] sm:$0xf0] }
  0x67   :  { %1346 = vmatpush.bf16.msrb.mxu3 %v1858_v3  ;;  %1298 = vmatmul.bf16.vlgmr.msra.gmra.mxu0 %v2975_v29  ;;  %v1994_v3 = vor.u32 %v2679_v59, %v1991_v60  ;;  %v2130_v26 = vor.u32 %v2713_v15, %v2127_v16  ;;  %v2707_v59 = vld [vmem:[#allocation2 + $0x224] sm:$0xf]  ;;  %v2733_v60 = vld [vmem:[#allocation2 + $0x2f4] sm:$0xf]  ;;  %v2095_v16 = vld [vmem:[#allocation2 + $0x218] sm:$0xf0] }
  0x68   :  { %1355 = vmatpush.bf16.msrb.mxu0 %v1954_v18  ;;  %1311 = vmatmul.bf16.vlgmr.msra.gmra.mxu1 %v2979_v33  ;;  %v1986_v18 = vor.u32 %v2677_v9, %v1983_v10  ;;  %v2106_v9 = vor.u32 %v2707_v59, %v2103_v62  ;;  %v2274_v10 = vor.u32 %v2749_v63, %v2271_v0  ;;  %v2741_v59 = vld [vmem:[#allocation2 + $0x334] sm:$0xf]  ;;  %v2303_v62 = vld [vmem:[#allocation2 + $0x3b8] sm:$0xf0] }
  0x69   :  { %1368 = vmatpush.bf16.msrb.mxu1 %v2018_v20  ;;  %1324 = vmatmul.bf16.vlgmr.msra.gmra.mxu2 %v2977_v30  ;;  %v2659_v20 = vld [vmem:[#allocation2 + $0xa4] sm:$0xf]  ;;  %v2777_v63 = vld [vmem:[#allocation2 + $0x454] sm:$0xf]  ;;  %v2383_v0 = vld [vmem:[#allocation2 + $0x458] sm:$0xf0] }
  0x6a   :  { %1381 = vmatpush.bf16.msrb.mxu2 %v2082_v25  ;;  %v1975_v25 = vld [vmem:[#allocation2 + $0x128] sm:$0xf0]  ;;  %v1914_v32 = vor.u32 %v2659_v20, %v1911_v23  ;;  %v2763_v20 = vld [vmem:[#allocation2 + $0x3e4] sm:$0xf]  ;;  %v2202_v23 = vor.u32 %v2731_v12, %v2199_v13 }
  0x6b   :  { %1347 = vmatpush.bf16.msrb.mxu3 %v1850_v24  ;;  %v2675_v24 = vld [vmem:[#allocation2 + $0x124] sm:$0xf]  ;;  %v2295_v12 = vld [vmem:[#allocation2 + $0x3a8] sm:$0xf0] }
  0x6c   :  { %1356 = vmatpush.bf16.msrb.mxu0 %v1946_v34  ;;  %v1978_v34 = vor.u32 %v2675_v24, %v1975_v25  ;;  %v2703_v24 = vld [vmem:[#allocation2 + $0x204] sm:$0xf] }
  0x6d   :  { %1369 = vmatpush.bf16.msrb.mxu1 %v2010_v36  ;;  %v2657_v36 = vld [vmem:[#allocation2 + $0x94] sm:$0xf]  ;;  %v2775_v13 = vld [vmem:[#allocation2 + $0x444] sm:$0xf] }
  0x6e   :  { %1382 = vmatpush.bf16.msrb.mxu2 %v2074_v40  ;;  %v1967_v40 = vld [vmem:[#allocation2 + $0x118] sm:$0xf0]  ;;  %v1906_v49 = vor.u32 %v2657_v36, %v1903_v38  ;;  %v2761_v36 = vld [vmem:[#allocation2 + $0x3d4] sm:$0xf] }
  0x6f   :  { %1348 = vmatpush.bf16.msrb.mxu3 %v1842_v39  ;;  %v2673_v39 = vld [vmem:[#allocation2 + $0x114] sm:$0xf] }
  0x70   :  { %1357 = vmatpush.bf16.msrb.mxu0 %v1938_v53  ;;  %v1970_v50 = vor.u32 %v2673_v39, %v1967_v40  ;;  %v2671_v53 = vld [vmem:[#allocation2 + $0x104] sm:$0xf]  ;;  %v2781_v38 = vld [vmem:[#allocation2 + $0x474] sm:$0xf]  ;;  %v2399_v39 = vld [vmem:[#allocation2 + $0x478] sm:$0xf0]  ;;  %v2194_v40 = vor.u32 %v2729_v28, %v2191_v21 }
  0x71   :  { %1370 = vmatpush.bf16.msrb.mxu1 %v2002_v54  ;;  %v2367_v28 = vld [vmem:[#allocation2 + $0x438] sm:$0xf0] }
  0x72   :  { %1383 = vmatpush.bf16.msrb.mxu2 %v2066_v57  ;;  %v2023_v57 = vld [vmem:[#allocation2 + $0x188] sm:$0xf0] }
  0x73   :  { %1349 = vmatpush.bf16.msrb.mxu3 %v1834_v56  ;;  %v2687_v56 = vld [vmem:[#allocation2 + $0x184] sm:$0xf] }
  0x74   :  { %1358 = vmatpush.bf16.msrb.mxu0 %v1930_v2  ;;  %v1962_v2 = vor.u32 %v2671_v53, %v1959_v55  ;;  %v2779_v53 = vld [vmem:[#allocation2 + $0x464] sm:$0xf]  ;;  %v2725_v55 = vld [vmem:[#allocation2 + $0x2b4] sm:$0xf] }
  0x75   :  { %1371 = vmatpush.bf16.msrb.mxu1 %v1994_v3  ;;  %v2765_v3 = vld [vmem:[#allocation2 + $0x3f4] sm:$0xf] }
  0x76   :  { %1384 = vmatpush.bf16.msrb.mxu2 %v2058_v5  ;;  %1350 = vmatmul.bf16.vlgmr.msrb.gmra.mxu3 %v2935_v14  ;;  %v2031_v14 = vld [vmem:[#allocation2 + $0x198] sm:$0xf0]  ;;  %v2026_v5 = vor.u32 %v2687_v56, %v2023_v57  ;;  %v2338_v15 = vor.u32 %v2765_v3, %v2335_v4  ;;  %v2314_v57 = vor.u32 %v2759_v51, %v2311_v52  ;;  %v2723_v3 = vld [vmem:[#allocation2 + $0x2a4] sm:$0xf]  ;;  %v2167_v4 = vld [vmem:[#allocation2 + $0x2a8] sm:$0xf0] }
  0x77   :  { %1394 = vmatpush.bf16.msra.mxu3 %v2146_v61  ;;  %v2034_v54 = vor.u32 %v2689_v46, %v2031_v14  ;;  %v2207_v61 = vld [vmem:[#allocation2 + $0x2f8] sm:$0xf0]  ;;  %v2727_v14 = vld [vmem:[#allocation2 + $0x2c4] sm:$0xf] }
  0x78   :  { %1359 = vmatpush.bf16.msrb.mxu0 %v1922_v17  ;;  %v2210_v6 = vor.u32 %v2733_v60, %v2207_v61  ;;  %v2747_v17 = vld [vmem:[#allocation2 + $0x364] sm:$0xf]  ;;  %v2175_v56 = vld [vmem:[#allocation2 + $0x2b8] sm:$0xf0]  ;;  %v2757_v61 = vld [vmem:[#allocation2 + $0x3b4] sm:$0xf] }
  0x79   :  { %1372 = vmatpush.bf16.msrb.mxu1 %v1986_v18  ;;  %v2263_v18 = vld [vmem:[#allocation2 + $0x368] sm:$0xf0]  ;;  %v2239_v60 = vld [vmem:[#allocation2 + $0x338] sm:$0xf0] }
  0x7a   :  { %1385 = vmatpush.bf16.msrb.mxu2 %v2050_v22  ;;  %v2327_v22 = vld [vmem:[#allocation2 + $0x3e8] sm:$0xf0] }
  0x7b   :  { %1395 = vmatpush.bf16.msra.mxu3 %v2138_v11  ;;  %v2705_v11 = vld [vmem:[#allocation2 + $0x214] sm:$0xf]  ;;  %v2330_v31 = vor.u32 %v2763_v20, %v2327_v22 }
  0x7c   :  { %1360 = vmatpush.bf16.msrb.mxu0 %v1914_v32  ;;  %v2098_v25 = vor.u32 %v2705_v11, %v2095_v16  ;;  %v2745_v32 = vld [vmem:[#allocation2 + $0x354] sm:$0xf]  ;;  %v2755_v11 = vld [vmem:[#allocation2 + $0x3a4] sm:$0xf]  ;;  %v2170_v16 = vor.u32 %v2723_v3, %v2167_v4  ;;  %v2447_v4 = vld [vmem:[#allocation2 + $0x4d8] sm:$0xf0] }
  0x7d   :  { %1373 = vmatpush.bf16.msrb.mxu1 %v1978_v34  ;;  %v2255_v34 = vld [vmem:[#allocation2 + $0x358] sm:$0xf0]  ;;  %v2298_v20 = vor.u32 %v2755_v11, %v2295_v12  ;;  %v2793_v3 = vld [vmem:[#allocation2 + $0x4d4] sm:$0xf] }
  0x7e   :  { %1386 = vmatpush.bf16.msrb.mxu2 %v2042_v37  ;;  %v2319_v37 = vld [vmem:[#allocation2 + $0x3d8] sm:$0xf0]  ;;  %v2258_v46 = vor.u32 %v2745_v32, %v2255_v34  ;;  %v2151_v34 = vld [vmem:[#allocation2 + $0x288] sm:$0xf0] }
  0x7f   :  { %1396 = vmatpush.bf16.msra.mxu3 %v2130_v26  ;;  %v2266_v26 = vor.u32 %v2747_v17, %v2263_v18  ;;  %v2322_v48 = vor.u32 %v2761_v36, %v2319_v37  ;;  %v2721_v18 = vld [vmem:[#allocation2 + $0x294] sm:$0xf]  ;;  %v2735_v36 = vld [vmem:[#allocation2 + $0x304] sm:$0xf]  ;;  %v2215_v37 = vld [vmem:[#allocation2 + $0x308] sm:$0xf0] }
  0x80   :  { %1361 = vmatpush.bf16.msrb.mxu0 %v1906_v49  ;;  %v2402_v49 = vor.u32 %v2781_v38, %v2399_v39  ;;  %v2218_v51 = vor.u32 %v2735_v36, %v2215_v37  ;;  %v2511_v11 = vld [vmem:[#allocation2 + $0x558] sm:$0xf0]  ;;  %v2803_v36 = vld [vmem:[#allocation2 + $0x524] sm:$0xf]  ;;  %v2487_v37 = vld [vmem:[#allocation2 + $0x528] sm:$0xf0] }
  0x81   :  { %1374 = vmatpush.bf16.msrb.mxu1 %v1970_v50  ;;  %v2743_v50 = vld [vmem:[#allocation2 + $0x344] sm:$0xf] }
  0x82   :  { %1387 = vmatpush.bf16.msrb.mxu2 %v2034_v54  ;;  %v2391_v54 = vld [vmem:[#allocation2 + $0x468] sm:$0xf0] }
  0x83   :  { %1397 = vmatpush.bf16.msra.mxu3 %v2122_v45  ;;  %v2090_v45 = vor.u32 %v2703_v24, %v2087_v27  ;;  %v2223_v24 = vld [vmem:[#allocation2 + $0x318] sm:$0xf0]  ;;  %v2773_v27 = vld [vmem:[#allocation2 + $0x434] sm:$0xf] }
  0x84   :  { %1362 = vmatpush.bf16.msrb.mxu0 %v1898_v1  ;;  %v2178_v1 = vor.u32 %v2725_v55, %v2175_v56  ;;  %v2370_v39 = vor.u32 %v2773_v27, %v2367_v28  ;;  %v2795_v55 = vld [vmem:[#allocation2 + $0x4e4] sm:$0xf]  ;;  %v2455_v56 = vld [vmem:[#allocation2 + $0x4e8] sm:$0xf0]  ;;  %v2495_v27 = vld [vmem:[#allocation2 + $0x538] sm:$0xf0] }
  0x85   :  { %1375 = vmatpush.bf16.msrb.mxu1 %v1962_v2  ;;  %v2242_v2 = vor.u32 %v2741_v59, %v2239_v60  ;;  %v2351_v59 = vld [vmem:[#allocation2 + $0x418] sm:$0xf0]  ;;  %v2811_v60 = vld [vmem:[#allocation2 + $0x564] sm:$0xf] }
  0x86   :  { %1388 = vmatpush.bf16.msrb.mxu2 %v2026_v5  ;;  %v2306_v5 = vor.u32 %v2757_v61, %v2303_v62  ;;  %v2519_v61 = vld [vmem:[#allocation2 + $0x568] sm:$0xf0] }
  0x87   :  { %1398 = vmatpush.bf16.msra.mxu3 %v2114_v58  ;;  %1363 = vmatmul.bf16.vlgmr.msrb.gmra.mxu0 %v2938_v19  ;;  %v2247_v19 = vld [vmem:[#allocation2 + $0x348] sm:$0xf0]  ;;  %v2394_v58 = vor.u32 %v2779_v53, %v2391_v54  ;;  %v2819_v53 = vld [vmem:[#allocation2 + $0x5a4] sm:$0xf] }
  0x88   :  { %1407 = vmatpush.bf16.msra.mxu0 %v2210_v6  ;;  %1376 = vmatmul.bf16.vlgmr.msrb.gmra.mxu1 %v2931_v7  ;;  %v2250_v7 = vor.u32 %v2743_v50, %v2247_v19  ;;  %v2386_v6 = vor.u32 %v2777_v63, %v2383_v0  ;;  %v2813_v50 = vld [vmem:[#allocation2 + $0x574] sm:$0xf]  ;;  %v2527_v19 = vld [vmem:[#allocation2 + $0x578] sm:$0xf0]  ;;  %v2551_v54 = vld [vmem:[#allocation2 + $0x5a8] sm:$0xf0]  ;;  %v2458_v63 = vor.u32 %v2795_v55, %v2455_v56 }
  0x89   :  { %1420 = vmatpush.bf16.msra.mxu1 %v2274_v10  ;;  %1389 = vmatmul.bf16.vlgmr.msrb.gmra.mxu2 %v2933_v8  ;;  %v2186_v8 = vor.u32 %v2727_v14, %v2183_v47  ;;  %v2231_v10 = vld [vmem:[#allocation2 + $0x328] sm:$0xf0]  ;;  %v2771_v47 = vld [vmem:[#allocation2 + $0x424] sm:$0xf]  ;;  %v2554_v62 = vor.u32 %v2819_v53, %v2551_v54  ;;  %v2817_v0 = vld [vmem:[#allocation2 + $0x594] sm:$0xf] }
  0x8a   :  { %1433 = vmatpush.bf16.msra.mxu2 %v2338_v15  ;;  %v2375_v15 = vld [vmem:[#allocation2 + $0x448] sm:$0xf0]  ;;  %v2799_v53 = vld [vmem:[#allocation2 + $0x504] sm:$0xf] }
  0x8b   :  { %1399 = vmatpush.bf16.msra.mxu3 %v2106_v9  ;;  %v2739_v9 = vld [vmem:[#allocation2 + $0x324] sm:$0xf]  ;;  %v2378_v22 = vor.u32 %v2775_v13, %v2375_v15  ;;  %v2279_v14 = vld [vmem:[#allocation2 + $0x388] sm:$0xf0]  ;;  %v2450_v13 = vor.u32 %v2793_v3, %v2447_v4 }
  0x8c   :  { %1408 = vmatpush.bf16.msra.mxu0 %v2202_v23  ;;  %v2234_v17 = vor.u32 %v2739_v9, %v2231_v10  ;;  %v2737_v23 = vld [vmem:[#allocation2 + $0x314] sm:$0xf]  ;;  %v2343_v9 = vld [vmem:[#allocation2 + $0x408] sm:$0xf0]  ;;  %v2815_v15 = vld [vmem:[#allocation2 + $0x584] sm:$0xf] }
  0x8d   :  { %1421 = vmatpush.bf16.msra.mxu1 %v2266_v26  ;;  %v2287_v26 = vld [vmem:[#allocation2 + $0x398] sm:$0xf0]  ;;  %v2226_v32 = vor.u32 %v2737_v23, %v2223_v24  ;;  %v2809_v10 = vld [vmem:[#allocation2 + $0x554] sm:$0xf]  ;;  %v2471_v54 = vld [vmem:[#allocation2 + $0x508] sm:$0xf0] }
  0x8e   :  { %1434 = vmatpush.bf16.msra.mxu2 %v2330_v31  ;;  %v2719_v31 = vld [vmem:[#allocation2 + $0x284] sm:$0xf]  ;;  %v2789_v24 = vld [vmem:[#allocation2 + $0x4b4] sm:$0xf]  ;;  %v2474_v55 = vor.u32 %v2799_v53, %v2471_v54 }
  0x8f   :  { %1400 = vmatpush.bf16.msra.mxu3 %v2098_v25  ;;  %v2753_v25 = vld [vmem:[#allocation2 + $0x394] sm:$0xf] }
  0x90   :  { %1409 = vmatpush.bf16.msra.mxu0 %v2194_v40  ;;  %v2290_v38 = vor.u32 %v2753_v25, %v2287_v26  ;;  %v2751_v40 = vld [vmem:[#allocation2 + $0x384] sm:$0xf]  ;;  %v2431_v25 = vld [vmem:[#allocation2 + $0x4b8] sm:$0xf0]  ;;  %v2805_v26 = vld [vmem:[#allocation2 + $0x534] sm:$0xf] }
  0x91   :  { %1422 = vmatpush.bf16.msra.mxu1 %v2258_v46  ;;  %v2463_v46 = vld [vmem:[#allocation2 + $0x4f8] sm:$0xf0]  ;;  %v2434_v28 = vor.u32 %v2789_v24, %v2431_v25 }
  0x92   :  { %1435 = vmatpush.bf16.msra.mxu2 %v2322_v48  ;;  %v2359_v48 = vld [vmem:[#allocation2 + $0x428] sm:$0xf0] }
  0x93   :  { %1401 = vmatpush.bf16.msra.mxu3 %v2090_v45  ;;  %v2797_v45 = vld [vmem:[#allocation2 + $0x4f4] sm:$0xf] }
  0x94   :  { %1410 = vmatpush.bf16.msra.mxu0 %v2186_v8  ;;  %v2466_v52 = vor.u32 %v2797_v45, %v2463_v46  ;;  %v2282_v8 = vor.u32 %v2751_v40, %v2279_v14  ;;  %v2785_v40 = vld [vmem:[#allocation2 + $0x494] sm:$0xf]  ;;  %v2415_v45 = vld [vmem:[#allocation2 + $0x498] sm:$0xf0]  ;;  %v2490_v46 = vor.u32 %v2803_v36, %v2487_v37 }
  0x95   :  { %1423 = vmatpush.bf16.msra.mxu1 %v2250_v7  ;;  %v2362_v7 = vor.u32 %v2771_v47, %v2359_v48  ;;  %v2801_v14 = vld [vmem:[#allocation2 + $0x514] sm:$0xf]  ;;  %v2479_v47 = vld [vmem:[#allocation2 + $0x518] sm:$0xf0] }
  0x96   :  { %1402 = vmatmul.bf16.vlgmr.msra.gmra.mxu3 %v2951_v41  ;;  %1436 = vmatpush.bf16.msra.mxu2 %v2314_v57  ;;  %v2159_v41 = vld [vmem:[#allocation2 + $0x298] sm:$0xf0]  ;;  %v2530_v57 = vor.u32 %v2813_v50, %v2527_v19  ;;  %v2783_v50 = vld [vmem:[#allocation2 + $0x484] sm:$0xf]  ;;  %v2407_v19 = vld [vmem:[#allocation2 + $0x488] sm:$0xf0] }
  0x97   :  { %1446 = vmatpush.bf16.msrb.mxu3 %v2402_v49  ;;  %v2162_v21 = vor.u32 %v2721_v18, %v2159_v41  ;;  %v2154_v49 = vor.u32 %v2719_v31, %v2151_v34  ;;  %v2791_v18 = vld [vmem:[#allocation2 + $0x4c4] sm:$0xf]  ;;  %v2439_v41 = vld [vmem:[#allocation2 + $0x4c8] sm:$0xf0]  ;;  %v2824_v36 = vld [vmem:[%s3089_s3 + $0x18] sm:$0xff] }
  0x98   :  { %1411 = vmatpush.bf16.msra.mxu0 %v2178_v1  ;;  %v2543_v1 = vld [vmem:[#allocation2 + $0x598] sm:$0xf0]  ;;  %v2442_v23 = vor.u32 %v2791_v18, %v2439_v41  ;;  %v2423_v31 = vld [vmem:[#allocation2 + $0x4a8] sm:$0xf0] }
  0x99   :  { %1424 = vmatpush.bf16.msra.mxu1 %v2242_v2  ;;  %v2546_v12 = vor.u32 %v2817_v0, %v2543_v1 }
  0x9a   :  { %1437 = vmatpush.bf16.msra.mxu2 %v2306_v5  ;;  %v2522_v5 = vor.u32 %v2811_v60, %v2519_v61 }
  0x9b   :  { %1447 = vmatpush.bf16.msrb.mxu3 %v2394_v58  ;;  %v2769_v58 = vld [vmem:[#allocation2 + $0x414] sm:$0xf] }
  0x9c   :  { %1412 = vmatpush.bf16.msra.mxu0 %v2170_v16  ;;  %v2354_v2 = vor.u32 %v2769_v58, %v2351_v59  ;;  %v2535_v16 = vld [vmem:[#allocation2 + $0x588] sm:$0xf0] }
  0x9d   :  { %1425 = vmatpush.bf16.msra.mxu1 %v2234_v17 }
  0x9e   :  { %1438 = vmatpush.bf16.msra.mxu2 %v2298_v20  ;;  %v2807_v20 = vld [vmem:[#allocation2 + $0x544] sm:$0xf] }
  0x9f   :  { %1448 = vmatpush.bf16.msrb.mxu3 %v2386_v6  ;;  %v2767_v6 = vld [vmem:[#allocation2 + $0x404] sm:$0xf] }
  0xa0   :  { %1413 = vmatpush.bf16.msra.mxu0 %v2162_v21  ;;  %v2346_v17 = vor.u32 %v2767_v6, %v2343_v9  ;;  %v2787_v21 = vld [vmem:[#allocation2 + $0x4a4] sm:$0xf] }
  0xa1   :  { %1426 = vmatpush.bf16.msra.mxu1 %v2226_v32  ;;  %v2498_v32 = vor.u32 %v2805_v26, %v2495_v27  ;;  %v2826_v26 = vld [vmem:[%s3089_s3 + $0x28] sm:$0xff] }
  0xa2   :  { %1439 = vmatpush.bf16.msra.mxu2 %v2290_v38 }
  0xa3   :  { %1449 = vmatpush.bf16.msrb.mxu3 %v2378_v22  ;;  %v2503_v22 = vld [vmem:[#allocation2 + $0x548] sm:$0xf0] }
  0xa4   :  { %1414 = vmatpush.bf16.msra.mxu0 %v2154_v49  ;;  %v1195_v34 = vpop.f32.mrf.mxu0 }
  0xa5   :  { %1427 = vmatpush.bf16.msra.mxu1 %v2218_v51  ;;  %v1208_v38 = vpop.f32.mrf.mxu1  ;;  %v2482_v51 = vor.u32 %v2801_v14, %v2479_v47  ;;  %v2822_v47 = vld [vmem:[%s3089_s3 + $0x8] sm:$0xff] }
  0xa6   :  { %1440 = vmatpush.bf16.msra.mxu2 %v2282_v8  ;;  %v1209_v59 = vadd.f32 %v1208_v38, %v1195_v34 }
  0xa7   :  { %1450 = vmatpush.bf16.msrb.mxu3 %v2370_v39  ;;  %1415 = vmatmul.bf16.vlgmr.msra.gmra.mxu0 %v2955_v44  ;;  %v2514_v44 = vor.u32 %v2809_v10, %v2511_v11  ;;  %v2426_v39 = vor.u32 %v2787_v21, %v2423_v31  ;;  %v2825_v21 = vld [vmem:[%s3089_s3 + $0x20] sm:$0xff] }
  0xa8   :  { %1459 = vmatpush.bf16.msrb.mxu0 %v2466_v52  ;;  %1428 = vmatmul.bf16.vlgmr.msra.gmra.mxu1 %v2949_v35  ;;  %v2538_v35 = vor.u32 %v2815_v15, %v2535_v16 }
  0xa9   :  { %1472 = vmatpush.bf16.msrb.mxu1 %v2530_v57  ;;  %1441 = vmatmul.bf16.vlgmr.msra.gmra.mxu2 %v2953_v42  ;;  %v2506_v42 = vor.u32 %v2807_v20, %v2503_v22 }
  0xaa   :  { %1490 = vmatpush.bf16.msrb.mxu2 %v2554_v62 }
  0xab   :  { %1451 = vmatpush.bf16.msrb.mxu3 %v2362_v7  ;;  %v2410_v7 = vor.u32 %v2783_v50, %v2407_v19 }
  0xac   :  { %1460 = vmatpush.bf16.msrb.mxu0 %v2458_v63  ;;  %v1221_v48 = vpop.f32.mrf.mxu2  ;;  %v1197_v52 = vpop.f32.mrf.mxu0 }
  0xad   :  { %1473 = vmatpush.bf16.msrb.mxu1 %v2522_v5  ;;  %v1234_v49 = vpop.f32.mrf.mxu3  ;;  %v1210_v8 = vpop.f32.mrf.mxu1  ;;  %v1222_v62 = vadd.f32 %v1221_v48, %v1209_v59  ;;  %v3024_v59 = vld [vmem:[%s3088_s2] ss:$2 sm:$0x3] }
  0xae   :  { %1491 = vmatpush.bf16.msrb.mxu2 %v2546_v12 }
  0xaf   :  { %1452 = vmatpush.bf16.msrb.mxu3 %v2354_v2  ;;  %v1235_v1 = vadd.f32 %v1234_v49, %v1222_v62  ;;  %v2821_v49 = vld [vmem:[%s3089_s3] sm:$0xff] }
  0xb0   :  { %1461 = vmatpush.bf16.msrb.mxu0 %v2450_v13 }
  0xb1   :  { %1474 = vmatpush.bf16.msrb.mxu1 %v2514_v44  ;;  %v2828_v44 = vld [vmem:[%s3089_s3 + $0x38] sm:$0xff] }
  0xb2   :  { %1492 = vmatpush.bf16.msrb.mxu2 %v2538_v35 }
  0xb3   :  { %1453 = vmatpush.bf16.msrb.mxu3 %v2346_v17 }
  0xb4   :  { %1462 = vmatpush.bf16.msrb.mxu0 %v2442_v23  ;;  %v1223_v56 = vpop.f32.mrf.mxu2  ;;  %v2827_v23 = vld [vmem:[%s3089_s3 + $0x30] sm:$0xff] }
  0xb5   :  { %1475 = vmatpush.bf16.msrb.mxu1 %v2506_v42  ;;  %v1236_v57 = vpop.f32.mrf.mxu3 }
  0xb6   :  { %1454 = vmatmul.bf16.vlgmr.msrb.gmra.mxu3 %v2975_v29  ;;  %v2418_v29 = vor.u32 %v2785_v40, %v2415_v45  ;;  %1703 = vmatpush.bf16.msra.mxu2 %v2828_v44  ;;  %v2823_v45 = vld [vmem:[%s3089_s3 + $0x10] sm:$0xff] }
  0xb8   :  { %1463 = vmatpush.bf16.msrb.mxu0 %v2434_v28 }
  0xb9   :  { %1476 = vmatpush.bf16.msrb.mxu1 %v2498_v32  ;;  %2556 = vmatmul.msk.bf16.vlgmr.msrb.gmra.mxu2 %vm1182_vm0, %v2967_v43 }
  0xba   :  { %1704 = vmatpush.bf16.msra.mxu2 %v2827_v23 }
  0xbc   :  { %1464 = vmatpush.bf16.msrb.mxu0 %v2426_v39 }
  0xbd   :  { %1477 = vmatpush.bf16.msrb.mxu1 %v2490_v46 }
  0xbe   :  { %1705 = vmatpush.bf16.msra.mxu2 %v2826_v26 }
  0xc0   :  { %1465 = vmatpush.bf16.msrb.mxu0 %v2418_v29 }
  0xc1   :  { %1478 = vmatpush.bf16.msrb.mxu1 %v2482_v51 }
  0xc2   :  { %1706 = vmatpush.bf16.msra.mxu2 %v2825_v21  ;;  %v2836_v21 = vld [vmem:[%s3089_s3 + $0x78] sm:$0xff] }
  0xc3   :  { %1716 = vmatpush.bf16.msra.mxu3 %v2836_v21 }
  0xc4   :  { %1466 = vmatpush.bf16.msrb.mxu0 %v2410_v7  ;;  %v1247_v43 = vpop.f32.mrf.mxu0 }
  0xc5   :  { %1479 = vmatpush.bf16.msrb.mxu1 %v2474_v55  ;;  %v1260_v58 = vpop.f32.mrf.mxu1  ;;  %v1248_v4 = vadd.f32 %v1247_v43, %v1235_v1  ;;  %v3029_v1 = vld [vmem:[%s3088_s2 + $0x1] ss:$2 sm:$0x3] }
  0xc6   :  { %1707 = vmatpush.bf16.msra.mxu2 %v2824_v36 }
  0xc7   :  { %1467 = vmatmul.bf16.vlgmr.msrb.gmra.mxu0 %v2979_v33  ;;  %v1261_v5 = vadd.f32 %v1260_v58, %v1248_v4 }
  0xc8   :  { %1480 = vmatmul.bf16.vlgmr.msrb.gmra.mxu1 %v2977_v30 }
  0xca   :  { %1708 = vmatpush.bf16.msra.mxu2 %v2823_v45 }
  0xcc   :  { %v1273_v60 = vpop.f32.mrf.mxu2  ;;  %v1249_v63 = vpop.f32.mrf.mxu0 }
  0xcd   :  { %v1286_v61 = vpop.f32.mrf.mxu3  ;;  %v1262_v0 = vpop.f32.mrf.mxu1  ;;  %v1274_v9 = vadd.f32 %v1273_v60, %v1261_v5  ;;  %v1565_v5 = vperm.slane %v3029_v1, 0 }
  0xce   :  { %1709 = vmatpush.bf16.msra.mxu2 %v2822_v47 }
  0xcf   :  { %v1287_v10 = vadd.f32 %v1286_v61, %v1274_v9 }
  0xd2   :  { %1710 = vmatpush.bf16.msra.mxu2 %v2821_v49 }
  0xd4   :  { %v1275_v2 = vpop.f32.mrf.mxu2 }
  0xd5   :  { %v1288_v3 = vpop.f32.mrf.mxu3  ;;  %v1558_v2 = vperm.slane %v3024_v59, 0 }
  0xdd   :  { %v1338_v6 = vpop.f32.mrf.mxu3 }
  0xe4   :  { %v1299_v11 = vpop.f32.mrf.mxu0 }
  0xe5   :  { %v1300_v33 = vadd.f32 %v1299_v11, %v1287_v10  ;;  %v1312_v12 = vpop.f32.mrf.mxu1  ;;  %v1340_v30 = vpop.f32.mrf.mxu3 }
  0xe7   :  { %v1313_v13 = vadd.f32 %v1312_v12, %v1300_v33 }
  0xec   :  { %v1325_v15 = vpop.f32.mrf.mxu2  ;;  %v1301_v17 = vpop.f32.mrf.mxu0 }
  0xed   :  { %v1326_v16 = vadd.f32 %v1325_v15, %v1313_v13  ;;  %v1314_v41 = vpop.f32.mrf.mxu1 }
  0xef   :  { %v1339_v18 = vadd.f32 %v1338_v6, %v1326_v16 }
  0xf1   :  { %v1498_v20 = vrot.slane %v1339_v18, 4 }
  0xf3   :  { %v1499_v22 = vadd.f32 %v1498_v20, %v1339_v18 }
  0xf4   :  { %v1327_v35 = vpop.f32.mrf.mxu2 }
  0xf5   :  { %v1500_v24 = vrot.slane %v1499_v22, 2 }
  0xf7   :  { %v1501_v25 = vadd.f32 %v1500_v24, %v1499_v22 }
  0xf9   :  { %v1351_v42 = vpop.f32.mrf.mxu3  ;;  %v1502_v27 = vrot.slane %v1501_v25, 1 }
  0xfb   :  { %v1503_v28 = vadd.f32 %v1502_v27, %v1501_v25 }
  0xfd   :  { %v1510_v31 = vmul.f32 0.125, %v1503_v28 }
  0xff   :  { %v1512_v32 = vsub.f32 %v1339_v18, %v1510_v31 }
 0x101   :  { %v1353_v34 = vpop.f32.mrf.mxu3  ;;  %v1514_v37 = vmul.f32 %v1512_v32, %v1512_v32 }
 0x103   :  { %v1516_v38 = vrot.slane %v1514_v37, 4 }
 0x104   :  { %v1364_v39 = vpop.f32.mrf.mxu0 }
 0x105   :  { %v1377_v40 = vpop.f32.mrf.mxu1  ;;  %v1517_v46 = vadd.f32 %v1516_v38, %v1514_v37  ;;  %v1365_v0 = vadd.f32 %v1364_v39, %v1351_v42  ;;  %v2835_v37 = vld [vmem:[%s3089_s3 + $0x70] sm:$0xff] }
 0x106   :  { %1717 = vmatpush.bf16.msra.mxu3 %v2835_v37 }
 0x107   :  { %v1518_v14 = vrot.slane %v1517_v46, 2  ;;  %v1378_v6 = vadd.f32 %v1377_v40, %v1365_v0  ;;  %v2834_v40 = vld [vmem:[%s3089_s3 + $0x68] sm:$0xff]  ;;  %v1559_v0 = vperm.slane %v3024_v59, 1 }
 0x109   :  { %v1519_v48 = vadd.f32 %v1518_v14, %v1517_v46  ;;  %v2833_v14 = vld [vmem:[%s3089_s3 + $0x60] sm:$0xff] }
 0x10a   :  { %1718 = vmatpush.bf16.msra.mxu3 %v2834_v40 }
 0x10b   :  { %v1520_v50 = vrot.slane %v1519_v48, 1 }
 0x10c   :  { %v1390_v29 = vpop.f32.mrf.mxu2  ;;  %v1366_v19 = vpop.f32.mrf.mxu0 }
 0x10d   :  { %v1379_v51 = vpop.f32.mrf.mxu1  ;;  %v1521_v52 = vadd.f32 %v1520_v50, %v1519_v48  ;;  %v1391_v30 = vadd.f32 %v1390_v29, %v1378_v6  ;;  %v2832_v29 = vld [vmem:[%s3089_s3 + $0x58] sm:$0xff]  ;;  %v2831_v19 = vld [vmem:[%s3089_s3 + $0x50] sm:$0xff] }
 0x10e   :  { %1719 = vmatpush.bf16.msra.mxu3 %v2833_v14  ;;  %v2844_v14 = vld [vmem:[%s3090_s4] ss:$0 sm:$0xff] }
 0x10f   :  { %v1528_v53 = vmul.f32 0.125, %v1521_v52  ;;  %v2830_v52 = vld [vmem:[%s3089_s3 + $0x48] sm:$0xff] }
 0x111   :  { %v1533_v54 = vadd.f32 1e-05, %v1528_v53 }
 0x112   :  { %1720 = vmatpush.bf16.msra.mxu3 %v2832_v29  ;;  %v2845_v29 = vld [vmem:[%s3090_s4 + $0x1] ss:$0 sm:$0xff] }
 0x113   :  { %2847 = vrsqrt.f32 %v1533_v54  ;;  %vm1541_vm2 = vweird.f32 %v1533_v54 }
 0x114   :  { %v1392_v8 = vpop.f32.mrf.mxu2 }
 0x115   :  { %v2829_v8 = vld [vmem:[%s3089_s3 + $0x40] sm:$0xff] }
 0x116   :  { %1721 = vmatpush.bf16.msra.mxu3 %v2831_v19 }
 0x119   :  { %v1403_v7 = vpop.f32.mrf.mxu3  ;;  %v2848_v55 = vpop.eup %2847 }
 0x11a   :  { %v1536_v56 = vmul.f32 %v2848_v55, %v1533_v54  ;;  %vm1542_vm1 = vweird.f32 %v2848_v55  ;;  %v1404_v16 = vadd.f32 %v1403_v7, %v1391_v30  ;;  %1722 = vmatpush.bf16.msra.mxu3 %v2830_v52  ;;  %v2846_v52 = vld [vmem:[%s3092_s6] ss:$0 sm:$0xff] }
 0x11b   :  { %vm1543_vm3 = vmor %vm1541_vm2, %vm1542_vm1 }
 0x11c   :  { %v1537_v43 = vmul.f32 %v2848_v55, %v1536_v56 }
 0x11e   :  { %v1538_v58 = vmul.f32 0.5, %v1537_v43  ;;  %1723 = vmatpush.bf16.msra.mxu3 %v2829_v8 }
 0x120   :  { %v1539_v60 = vsub.f32 1.5, %v1538_v58 }
 0x121   :  { %v1405_v57 = vpop.f32.mrf.mxu3 }
 0x122   :  { %v1540_v63 = vmul.f32 %v2848_v55, %v1539_v60 }
 0x124   :  { %v1416_v61 = vpop.f32.mrf.mxu0  ;;  %v1544_v3 = vsel %vm1543_vm3, %v2848_v55, %v1540_v63 }
 0x125   :  { %v1429_v62 = vpop.f32.mrf.mxu1  ;;  %v1555_v4 = vmul.f32 %v1544_v3, %v1512_v32  ;;  %v1417_v41 = vadd.f32 %v1416_v61, %v1404_v16 }
 0x127   :  { %v1562_v9 = vmul.f32 %v1558_v2, %v1555_v4  ;;  %v1430_v44 = vadd.f32 %v1429_v62, %v1417_v41  ;;  %v1566_v4 = vperm.slane %v3029_v1, 1 }
 0x129   :  { %v1569_v12 = vadd.f32 %v1565_v5, %v1562_v9 }
 0x12b   :  { %v1571_v13 = vmax.f32 %v1569_v12, 0.0 }
 0x12c   :  { %v1442_v10 = vpop.f32.mrf.mxu2  ;;  %v1418_v11 = vpop.f32.mrf.mxu0 }
 0x12d   :  { %v1431_v33 = vpop.f32.mrf.mxu1  ;;  %v1573_v15 = vpack.c.bf16 %v1571_v13, %v1571_v13  ;;  %v1443_v35 = vadd.f32 %v1442_v10, %v1430_v44 }
 0x12f   :  { %1711 = vmatmul.bf16.vlgmr.msra.gmra.mxu2 %v1573_v15 }
 0x134   :  { %v1444_v18 = vpop.f32.mrf.mxu2 }
 0x139   :  { %v1455_v17 = vpop.f32.mrf.mxu3 }
 0x13a   :  { %v1456_v23 = vadd.f32 %v1455_v17, %v1443_v35  ;;  %v2840_v35 = vld [vmem:[%s3091_s5 + $0x18] sm:$0xff] }
 0x13b   :  { %1811 = vmatpush.bf16.msra.mxu0 %v2840_v35 }
 0x13c   :  { %v1494_v20 = vpop.f32.mrf.mxu2 }
 0x141   :  { %v1457_v22 = vpop.f32.mrf.mxu3 }
 0x144   :  { %v1468_v24 = vpop.f32.mrf.mxu0  ;;  %v1496_v27 = vpop.f32.mrf.mxu2 }
 0x145   :  { %v1469_v25 = vadd.f32 %v1468_v24, %v1456_v23  ;;  %v1481_v42 = vpop.f32.mrf.mxu1  ;;  %v2838_v27 = vld [vmem:[%s3091_s5 + $0x8] sm:$0xff] }
 0x147   :  { %v1482_v26 = vadd.f32 %v1481_v42, %v1469_v25  ;;  %v2839_v25 = vld [vmem:[%s3091_s5 + $0x10] sm:$0xff] }
 0x148   :  { %1812 = vmatpush.bf16.msra.mxu0 %v2839_v25 }
 0x149   :  { %v1495_v28 = vadd.f32 %v1494_v20, %v1482_v26 }
 0x14b   :  { %v1504_v31 = vrot.slane %v1495_v28, 4 }
 0x14c   :  { %v1470_v32 = vpop.f32.mrf.mxu0  ;;  %1813 = vmatpush.bf16.msra.mxu0 %v2838_v27 }
 0x14d   :  { %v1505_v34 = vadd.f32 %v1504_v31, %v1495_v28  ;;  %v1483_v36 = vpop.f32.mrf.mxu1  ;;  %v2837_v31 = vld [vmem:[%s3091_s5] sm:$0xff] }
 0x14f   :  { %v1506_v38 = vrot.slane %v1505_v34, 2 }
 0x150   :  { %1814 = vmatpush.bf16.msra.mxu0 %v2837_v31 }
 0x151   :  { %v1507_v39 = vadd.f32 %v1506_v38, %v1505_v34 }
 0x153   :  { %v1508_v45 = vrot.slane %v1507_v39, 1 }
 0x155   :  { %v1509_v46 = vadd.f32 %v1508_v45, %v1507_v39 }
 0x157   :  { %v1511_v47 = vmul.f32 0.125, %v1509_v46 }
 0x159   :  { %v1513_v48 = vsub.f32 %v1495_v28, %v1511_v47 }
 0x15b   :  { %v1515_v49 = vmul.f32 %v1513_v48, %v1513_v48 }
 0x15d   :  { %v1522_v50 = vrot.slane %v1515_v49, 4 }
 0x15f   :  { %v1523_v51 = vadd.f32 %v1522_v50, %v1515_v49 }
 0x161   :  { %v1524_v53 = vrot.slane %v1523_v51, 2 }
 0x163   :  { %v1525_v54 = vadd.f32 %v1524_v53, %v1523_v51 }
 0x165   :  { %v1526_v7 = vrot.slane %v1525_v54, 1 }
 0x167   :  { %v1527_v55 = vadd.f32 %v1526_v7, %v1525_v54 }
 0x169   :  { %v1529_v56 = vmul.f32 0.125, %v1527_v55 }
 0x16b   :  { %v1534_v57 = vadd.f32 1e-05, %v1529_v56 }
 0x16d   :  { %2849 = vrsqrt.f32 %v1534_v57  ;;  %vm1551_vm5 = vweird.f32 %v1534_v57 }
 0x173   :  { %v2850_v43 = vpop.eup %2849 }
 0x174   :  { %v1546_v58 = vmul.f32 %v2850_v43, %v1534_v57  ;;  %vm1552_vm4 = vweird.f32 %v2850_v43 }
 0x175   :  { %vm1553_vm6 = vmor %vm1551_vm5, %vm1552_vm4 }
 0x176   :  { %v1547_v60 = vmul.f32 %v2850_v43, %v1546_v58 }
 0x178   :  { %v1548_v61 = vmul.f32 0.5, %v1547_v60 }
 0x17a   :  { %v1549_v62 = vsub.f32 1.5, %v1548_v61 }
 0x17c   :  { %v1550_v63 = vmul.f32 %v2850_v43, %v1549_v62 }
 0x17e   :  { %v1554_v2 = vsel %vm1553_vm6, %v2850_v43, %v1550_v63 }
 0x17f   :  { %v1556_v3 = vmul.f32 %v1554_v2, %v1513_v48 }
 0x181   :  { %v1563_v5 = vmul.f32 %v1559_v0, %v1556_v3 }
 0x183   :  { %v1570_v6 = vadd.f32 %v1566_v4, %v1563_v5 }
 0x185   :  { %v1572_v9 = vmax.f32 %v1570_v6, 0.0 }
 0x187   :  { %v1574_v10 = vpack.c.bf16 %v1572_v9, %v1572_v9 }
 0x189   :  { %1724 = vmatmul.bf16.vlgmr.msra.gmra.mxu3 %v1574_v10 }
 0x1b2   :  { %v1712_v11 = vpop.f32.mrf.mxu2 }
 0x1ba   :  { %v1714_v33 = vpop.f32.mrf.mxu2 }
 0x20c   :  { %v1725_v12 = vpop.f32.mrf.mxu3 }
 0x20d   :  { %v1726_v30 = vadd.f32 %v1725_v12, %v1712_v11 }
 0x20f   :  { %v1730_v13 = vsel %vm1729_vm7, %v1726_v30, 0.0 }
 0x210   :  { %v1731_v15 = vrot.slane %v1730_v13, 4 }
 0x212   :  { %v1732_v16 = vadd.f32 %v1731_v15, %v1730_v13 }
 0x214   :  { %v1733_v17 = vrot.slane %v1732_v16, 2  ;;  %v1727_v59 = vpop.f32.mrf.mxu3 }
 0x216   :  { %v1734_v18 = vadd.f32 %v1733_v17, %v1732_v16 }
 0x218   :  { %v1735_v41 = vrot.slane %v1734_v18, 1 }
 0x21a   :  { %v1736_v44 = vadd.f32 %v1735_v41, %v1734_v18 }
 0x21c   :  { %v1737_v1 = vmul.f32 0.125, %v1736_v44 }
 0x21e   :  { %v1738_v20 = vsub.f32 %v1726_v30, %v1737_v1 }
 0x220   :  { %v1739_v22 = vmul.f32 %v1738_v20, %v1738_v20 }
 0x222   :  { %v1740_v23 = vsel %vm1729_vm7, %v1739_v22, 0.0 }
 0x223   :  { %v1741_v24 = vrot.slane %v1740_v23, 4 }
 0x225   :  { %v1742_v42 = vadd.f32 %v1741_v24, %v1740_v23 }
 0x227   :  { %v1743_v26 = vrot.slane %v1742_v42, 2 }
 0x229   :  { %v1744_v28 = vadd.f32 %v1743_v26, %v1742_v42 }
 0x22b   :  { %v1745_v21 = vrot.slane %v1744_v28, 1 }
 0x22d   :  { %v1746_v32 = vadd.f32 %v1745_v21, %v1744_v28 }
 0x22f   :  { %v1747_v34 = vmul.f32 0.125, %v1746_v32 }
 0x231   :  { %v1750_v36 = vadd.f32 1e-05, %v1747_v34 }
 0x233   :  { %2851 = vrsqrt.f32 %v1750_v36  ;;  %vm1757_vm9 = vweird.f32 %v1750_v36 }
 0x239   :  { %v2852_v37 = vpop.eup %2851 }
 0x23a   :  { %v1752_v38 = vmul.f32 %v2852_v37, %v1750_v36  ;;  %vm1758_vm8 = vweird.f32 %v2852_v37 }
 0x23b   :  { %vm1759_vm10 = vmor %vm1757_vm9, %vm1758_vm8 }
 0x23c   :  { %v1753_v39 = vmul.f32 %v2852_v37, %v1752_v38 }
 0x23e   :  { %v1754_v40 = vmul.f32 0.5, %v1753_v39 }
 0x240   :  { %v1755_v45 = vsub.f32 1.5, %v1754_v40 }
 0x242   :  { %v1756_v46 = vmul.f32 %v2852_v37, %v1755_v45 }
 0x244   :  { %v1760_v47 = vsel %vm1759_vm10, %v2852_v37, %v1756_v46 }
 0x245   :  { %v1761_v48 = vmul.f32 %v1760_v47, %v1738_v20 }
 0x247   :  { %v1763_v49 = vmul.f32 %v2844_v14, %v1761_v48 }
 0x249   :  { %v1765_v50 = vadd.f32 %v2845_v29, %v1763_v49 }
 0x24b   :  { %v1766_v19 = vmax.f32 %v1765_v50, 0.0 }
 0x24d   :  { %v1767_v51 = vpack.c.bf16 %v1766_v19, %v1766_v19 }
 0x24f   :  { %2638 = vmatmul.msk.bf16.vlgmr.msra.gmra.mxu0 %vm1729_vm7, %v1767_v51 }
 0x2cc   :  { %v1816_v53 = vpop.f32.mrf.mxu0 }
 0x2cd   :  { %v1817_v54 = vadd.f32 %v2846_v52, %v1816_v53 }
 0x2cf   :  { %1821 = vst.msk [vmem:[%s3093_s7] sm:$0xff] %vm1820_vm11, %v1817_v54 }
 0x2d4   :  { %v1818_v8 = vpop.f32.mrf.mxu0 }
 0x2d5   :  { %1826 = vsyncpa [#allocation3], 1 }

</bundles_post_ra>
